<compile_context>
chip_gen: v7x
topology: tpu7x:2x2x1
jax: 0.10.0
libtpu: 0.0.40
codegen_flags: <defaults>
</compile_context>

<pallas_src>
import functools
import math

import jax
import jax.numpy as jnp
from jax.experimental import pallas as pl
from jax.experimental.pallas import tpu as pltpu


def _fuse_kernel(spk_ref, sph_ref, wk_ref, wv_ref, wq_ref, wc_ref, out_ref, *,
                 n_head, fuse_heads):
    """One grid step processes a block of Bb batch rows.

    spk_ref: (Bb, T, D)                 speaker features (compute dtype)
    sph_ref: (Bb, T_hat, D)             speech features (output dtype, exact)
    wk_ref / wv_ref: (D, D)             pre-transposed K / V projections
    wq_ref: (D, H*D) if fuse_heads else (H, D, D)   Q projection (1/sqrt(D) folded)
    wc_ref: (H, D, D)                   c_proj slabs (x @ W layout)
    out_ref: (Bb, T_hat, 2*D)           [attention output | speech passthrough]
    """
    Bb, T, D = spk_ref.shape
    T_hat = sph_ref.shape[1]
    Tk = T // n_head
    cdt = wk_ref.dtype                  # MXU operand dtype (f32 or bf16)

    # Fold the batch block into the MXU M dimension for the projections.
    spk2 = spk_ref[...].reshape(Bb * T, D)
    sph = sph_ref[...]                               # kept exact for passthrough
    sph2 = sph.astype(cdt).reshape(Bb * T_hat, D)

    # K / V projections: one MXU call each with M = Bb*T.
    k = jnp.dot(spk2, wk_ref[...], preferred_element_type=jnp.float32)
    v = jnp.dot(spk2, wv_ref[...], preferred_element_type=jnp.float32)
    # Single up-front reshape to per-head layout: head access below is a free
    # leading-axis index (no per-iteration sublane slicing).
    k = k.astype(cdt).reshape(Bb, n_head, Tk, D)
    v = v.astype(cdt).reshape(Bb, n_head, Tk, D)

    if fuse_heads:
        # Q projection fused across heads: one MXU call with N = H*D; the
        # per-head slice below is a lane-group selection (D % 128 == 0).
        q2 = jnp.dot(sph2, wq_ref[...], preferred_element_type=jnp.float32)
        q2 = q2.astype(cdt)                          # (Bb*T_hat, H*D)

    att_heads = []
    for h in range(n_head):                          # static unroll; H is small
        if fuse_heads:
            qh = q2[:, h * D:(h + 1) * D].reshape(Bb, T_hat, D)
        else:
            qh = jnp.dot(sph2, wq_ref[h], preferred_element_type=jnp.float32)
            qh = qh.astype(cdt).reshape(Bb, T_hat, D)
        kh = k[:, h]                                 # (Bb, Tk, D)
        vh = v[:, h]                                 # (Bb, Tk, D)

        # Batched scores, contracting the last dims of both operands (same
        # dot_general form as the reference flash-attention kernel; no
        # explicit kh transpose in the kernel body).
        s = jnp.einsum("bqd,bkd->bqk", qh, kh,
                       preferred_element_type=jnp.float32)
        # Softmax in f32; the row-sum reciprocal runs on the EUP slot.
        s = s - jnp.max(s, axis=-1, keepdims=True)
        p = jnp.exp(s)
        p = p * pl.reciprocal(jnp.sum(p, axis=-1, keepdims=True), approx=True)

        att = jnp.einsum("bqk,bkd->bqd", p.astype(cdt), vh,
                         preferred_element_type=jnp.float32)   # (Bb, T_hat, D)
        att_heads.append(att.astype(cdt))

    if fuse_heads:
        # c_proj fused across heads: contraction K = H*D fills the 256-deep
        # MXU; the head concat is a pure lane-layout op when D % 128 == 0.
        att_all = jnp.concatenate(att_heads, axis=-1)
        att_all = att_all.reshape(Bb * T_hat, n_head * D)
        y = jnp.dot(att_all, wc_ref[...].reshape(n_head * D, D),
                    preferred_element_type=jnp.float32)
    else:
        # Heads not lane-aligned: accumulate per-head slabs instead of paying
        # a lane-relayout concat.
        y = jnp.dot(att_heads[0].reshape(Bb * T_hat, D), wc_ref[0],
                    preferred_element_type=jnp.float32)
        for h in range(1, n_head):
            y = y + jnp.dot(att_heads[h].reshape(Bb * T_hat, D), wc_ref[h],
                            preferred_element_type=jnp.float32)

    y = y.reshape(Bb, T_hat, D).astype(out_ref.dtype)
    # Fused output store: [y | speech] -> one dense 2*D-lane store per row;
    # the wrapper no longer concatenates (no extra HBM read + rewrite).
    out_ref[...] = jnp.concatenate([y, sph.astype(out_ref.dtype)], axis=-1)


def _pick_vmem_limit():
    """Scoped-VMEM budget: ~3/4 of physical VMEM, capped at 96 MiB.

    v7x (64 MiB physical) -> 48 MiB; v5e / v6e (128 MiB) -> 96 MiB.
    """
    try:
        vmem_cap = int(getattr(pltpu.get_tpu_info(), "vmem_capacity_bytes", 0))
    except Exception:
        vmem_cap = 0
    if vmem_cap <= 0:
        vmem_cap = 64 * 1024 * 1024          # conservative (v7x-sized) default
    return min((vmem_cap * 3) // 4, 96 * 1024 * 1024)


def _pick_b_blk(B, T, T_hat, D, n_head, compute_bytes, out_bytes,
                vmem_limit_bytes):
    """Largest divisor of B whose per-step working set fits ~70% of budget."""
    f32 = 4
    Tk = T // n_head
    per_row = (
        2 * T * D * compute_bytes                   # speaker block (dbl-buffered)
        + 2 * T_hat * D * out_bytes                 # speech block (dbl-buffered)
        + 2 * T_hat * 2 * D * out_bytes             # output block (dbl-buffered)
        + 2 * T * D * (f32 + compute_bytes)         # k and v (f32 result + cast)
        + n_head * T_hat * D * (f32 + compute_bytes)  # q (all heads)
        + 2 * T_hat * Tk * f32                      # scores / probs (one head)
        + n_head * T_hat * D * (f32 + compute_bytes)  # per-head att outputs
        + T_hat * 2 * D * f32                       # y / output staging
    )
    weight_bytes = 2 * (2 + 2 * n_head) * D * D * compute_bytes  # <= 2 buffers
    budget = int(0.7 * vmem_limit_bytes) - weight_bytes
    max_rows = max(1, budget // max(per_row, 1))
    # Keep the grid extent >= 2 whenever possible so both TensorCores of a
    # v7x chip get work (near-free elsewhere: ~0.35 us per extra grid step).
    max_rows = min(max_rows, max(1, B // 2))
    return max(d for d in range(1, B + 1) if B % d == 0 and d <= max_rows)


def fuse_module2(speaker_feat, speech_feat, params, n_head=4, b_blk=None,
                 compute_dtype=None, fuse_heads=None, vmem_limit_bytes=None):
    """Pallas forward of FuseModule2 (eval mode: dropout = 0).

    params: dict of PyTorch-layout weights (out_features, in_features).
    compute_dtype: dtype of the MXU operands (jnp.bfloat16 recommended on
      v6e / v7x for ~2x MXU throughput and half the activation VMEM);
      accumulation / softmax stay float32 and the speech half of the output
      is copied bit-exactly. Defaults to the speaker input dtype.
    """
    B, T, D = speaker_feat.shape
    Bs, T_hat, Ds = speech_feat.shape
    assert Bs == B and Ds == D
    assert T % n_head == 0, "speaker length must be divisible by n_head"

    out_dtype = speech_feat.dtype
    if compute_dtype is None:
        compute_dtype = speaker_feat.dtype
    if fuse_heads is None:
        # Fused Q / c_proj paths rely on lane-aligned per-head slices/concat.
        fuse_heads = (D % 128 == 0)
    if vmem_limit_bytes is None:
        vmem_limit_bytes = _pick_vmem_limit()
    if b_blk is None:
        b_blk = _pick_b_blk(B, T, T_hat, D, n_head,
                            jnp.dtype(compute_dtype).itemsize,
                            jnp.dtype(out_dtype).itemsize,
                            vmem_limit_bytes)
    assert B % b_blk == 0

    # Weight prep: pre-transposed so the kernel does x @ W directly; the
    # 1/sqrt(D) attention scale is folded into Wq.
    scale = 1.0 / math.sqrt(D)
    wk = params["k_attn"].T.astype(compute_dtype)                   # (D, D)
    wv = params["v_attn"].T.astype(compute_dtype)                   # (D, D)
    wq_full = params["q_attn"].T * scale                            # (D, H*D)
    if fuse_heads:
        wq = wq_full.astype(compute_dtype)                          # (D, H*D)
    else:
        wq = (wq_full.reshape(D, n_head, D).transpose(1, 0, 2)
              .astype(compute_dtype))                               # (H, D, D)
    wc = params["c_proj"].T.reshape(n_head, D, D).astype(compute_dtype)

    spk = speaker_feat.astype(compute_dtype)
    sph = speech_feat                     # left in out_dtype (exact passthrough)

    kernel = functools.partial(_fuse_kernel, n_head=n_head,
                               fuse_heads=fuse_heads)

    def call(weight_mode):
        def wspec(shape):
            idx = (lambda b: (0, 0)) if len(shape) == 2 else (lambda b: (0, 0, 0))
            if weight_mode is None:
                return pl.BlockSpec(shape, idx)
            return pl.BlockSpec(shape, idx, pipeline_mode=weight_mode)

        return pl.pallas_call(
            kernel,
            out_shape=jax.ShapeDtypeStruct((B, T_hat, 2 * D), out_dtype),
            grid_spec=pltpu.PrefetchScalarGridSpec(
                num_scalar_prefetch=0,
                grid=(B // b_blk,),
                in_specs=[
                    pl.BlockSpec((b_blk, T, D), lambda b: (b, 0, 0)),
                    pl.BlockSpec((b_blk, T_hat, D), lambda b: (b, 0, 0)),
                    wspec(wk.shape),
                    wspec(wv.shape),
                    wspec(wq.shape),
                    wspec(wc.shape),
                ],
                out_specs=pl.BlockSpec((b_blk, T_hat, 2 * D),
                                       lambda b: (b, 0, 0)),
            ),
            compiler_params=pltpu.CompilerParams(
                dimension_semantics=("parallel",),
                vmem_limit_bytes=int(vmem_limit_bytes)),
        )(spk, sph, wk, wv, wq, wc)

    try:
        # The weight index_maps are constant, so double-buffering them only
        # wastes VMEM; request single buffering.
        return call(pl.Buffered(1))
    except Exception:
        # pipeline_mode / Buffered(1) support varies across JAX versions;
        # fall back to default (double-buffered) weight specs.
        return call(None)


def _reference(speaker_feat, speech_feat, params, n_head=4):
    """Pure-JAX reference mirroring the PyTorch forward (eval mode)."""
    B, T, D = speaker_feat.shape
    T_hat = speech_feat.shape[1]
    k = speaker_feat @ params["k_attn"].T
    v = speaker_feat @ params["v_attn"].T
    q = speech_feat @ params["q_attn"].T
    query = q.reshape(B, T_hat, n_head, D).transpose(0, 2, 1, 3)
    key = k.reshape(B, n_head, T // n_head, D)
    value = v.reshape(B, n_head, T // n_head, D)
    s = jnp.einsum("bhqd,bhkd->bhqk", query, key) / math.sqrt(D)
    p = jax.nn.softmax(s, axis=-1)
    att = jnp.einsum("bhqk,bhkd->bhqd", p, value)
    y = att.transpose(0, 2, 1, 3).reshape(B, T_hat, n_head * D)
    y = y @ params["c_proj"].T
    return jnp.concatenate([y, speech_feat], axis=2)


def _run_case(key, B, T, T_hat, D, n_head, compute_dtype=None, tol=5e-3):
    ks = jax.random.split(key, 6)

    def linear_init(k, out_f, in_f):
        bound = 1.0 / math.sqrt(in_f)
        return jax.random.uniform(k, (out_f, in_f), jnp.float32, -bound, bound)

    params = {
        "q_attn": linear_init(ks[0], n_head * D, D),
        "k_attn": linear_init(ks[1], D, D),
        "v_attn": linear_init(ks[2], D, D),
        "c_proj": linear_init(ks[3], D, n_head * D),
    }
    speaker_feat = jax.random.normal(ks[4], (B, T, D), jnp.float32)
    speech_feat = jax.random.normal(ks[5], (B, T_hat, D), jnp.float32)

    out = fuse_module2(speaker_feat, speech_feat, params, n_head=n_head,
                       compute_dtype=compute_dtype)
    out = jax.block_until_ready(out)

    ref = _reference(speaker_feat, speech_feat, params, n_head=n_head)
    assert out.shape == (B, T_hat, 2 * D)
    max_err = float(jnp.max(jnp.abs(out - ref)))
    assert jnp.allclose(out, ref, atol=tol, rtol=tol), (
        f"B={B} T={T} T_hat={T_hat} D={D} cdt={compute_dtype} "
        f"max_err={max_err}")
    return max_err


if __name__ == "__main__":
    key = jax.random.PRNGKey(0)
    k1, k2, k3 = jax.random.split(key, 3)

    # 1) Small, spec-like shapes (D not lane-aligned -> per-head weight path).
    _run_case(k1, B=2, T=16, T_hat=8, D=32, n_head=4, tol=5e-3)
    # 2) Lane-aligned D -> fused Q / c_proj path (single big MXU calls).
    _run_case(k2, B=2, T=32, T_hat=16, D=128, n_head=4, tol=5e-3)
    # 3) bf16 MXU operands (f32 accumulation / softmax); looser tolerance.
    _run_case(k3, B=2, T=32, T_hat=16, D=128, n_head=4,
              compute_dtype=jnp.bfloat16, tol=5e-2)

    print("KERNEL_OK")
</pallas_src>

<mosaic_0001>
module attributes {stable_mosaic.version = 11 : i64} {
  func.func @_fuse_kernel(%arg0: i32, %arg1: memref<1x16x32xf32, #tpu.memory_space<vmem>>, %arg2: memref<1x8x32xf32, #tpu.memory_space<vmem>>, %arg3: memref<32x32xf32, #tpu.memory_space<vmem>>, %arg4: memref<32x32xf32, #tpu.memory_space<vmem>>, %arg5: memref<4x32x32xf32, #tpu.memory_space<vmem>>, %arg6: memref<4x32x32xf32, #tpu.memory_space<vmem>>, %arg7: memref<1x8x64xf32, #tpu.memory_space<vmem>>) attributes {dimension_semantics = [#tpu.dimension_semantics<parallel>], iteration_bounds = array<i64: 2>, scalar_prefetch = 0 : i64, scratch_operands = 0 : i64, tpu.core_type = #tpu.core_type<tc>, window_params = [{transform_indices = @transform_0, window_bounds = array<i64: 1, 16, 32>}, {transform_indices = @transform_1, window_bounds = array<i64: 1, 8, 32>}, {pipeline_mode = #tpu.pipeline_mode<synchronous>, transform_indices = @transform_2, window_bounds = array<i64: 32, 32>}, {pipeline_mode = #tpu.pipeline_mode<synchronous>, transform_indices = @transform_3, window_bounds = array<i64: 32, 32>}, {pipeline_mode = #tpu.pipeline_mode<synchronous>, transform_indices = @transform_4, window_bounds = array<i64: 4, 32, 32>}, {pipeline_mode = #tpu.pipeline_mode<synchronous>, transform_indices = @transform_5, window_bounds = array<i64: 4, 32, 32>}, {transform_indices = @transform_6, window_bounds = array<i64: 1, 8, 64>}]} {
    %c0 = arith.constant 0 : index
    %c0_0 = arith.constant 0 : index
    %c0_1 = arith.constant 0 : index
    %0 = vector.load %arg1[%c0, %c0_0, %c0_1] : memref<1x16x32xf32, #tpu.memory_space<vmem>>, vector<1x16x32xf32>
    %1 = vector.shape_cast %0 : vector<1x16x32xf32> to vector<16x32xf32>
    %c0_2 = arith.constant 0 : index
    %c0_3 = arith.constant 0 : index
    %c0_4 = arith.constant 0 : index
    %2 = vector.load %arg2[%c0_2, %c0_3, %c0_4] : memref<1x8x32xf32, #tpu.memory_space<vmem>>, vector<1x8x32xf32>
    %3 = vector.shape_cast %2 : vector<1x8x32xf32> to vector<8x32xf32>
    %c0_5 = arith.constant 0 : index
    %c0_6 = arith.constant 0 : index
    %4 = vector.load %arg3[%c0_5, %c0_6] : memref<32x32xf32, #tpu.memory_space<vmem>>, vector<32x32xf32>
    %cst = arith.constant dense<0.000000e+00> : vector<16x32xf32>
    %5 = tpu.matmul %1, %4, %cst {dimension_numbers = #tpu.dot_dimension_numbers<[1], [0], [0], [1], [0, 0, 1, 1], [], []>} : vector<16x32xf32>, vector<32x32xf32>, vector<16x32xf32> -> vector<16x32xf32>
    %c0_7 = arith.constant 0 : index
    %c0_8 = arith.constant 0 : index
    %6 = vector.load %arg4[%c0_7, %c0_8] : memref<32x32xf32, #tpu.memory_space<vmem>>, vector<32x32xf32>
    %cst_9 = arith.constant dense<0.000000e+00> : vector<16x32xf32>
    %7 = tpu.matmul %1, %6, %cst_9 {dimension_numbers = #tpu.dot_dimension_numbers<[1], [0], [0], [1], [0, 0, 1, 1], [], []>} : vector<16x32xf32>, vector<32x32xf32>, vector<16x32xf32> -> vector<16x32xf32>
    %8 = vector.shape_cast %5 : vector<16x32xf32> to vector<1x4x4x32xf32>
    %9 = vector.shape_cast %7 : vector<16x32xf32> to vector<1x4x4x32xf32>
    %c0_10 = arith.constant 0 : index
    %c0_11 = arith.constant 0 : index
    %c0_12 = arith.constant 0 : index
    %10 = vector.load %arg5[%c0_10, %c0_11, %c0_12] : memref<4x32x32xf32, #tpu.memory_space<vmem>>, vector<1x32x32xf32>
    %11 = vector.shape_cast %10 : vector<1x32x32xf32> to vector<32x32xf32>
    %cst_13 = arith.constant dense<0.000000e+00> : vector<8x32xf32>
    %12 = tpu.matmul %3, %11, %cst_13 {dimension_numbers = #tpu.dot_dimension_numbers<[1], [0], [0], [1], [0, 0, 1, 1], [], []>} : vector<8x32xf32>, vector<32x32xf32>, vector<8x32xf32> -> vector<8x32xf32>
    %13 = vector.shape_cast %12 : vector<8x32xf32> to vector<1x8x32xf32>
    %14 = vector.extract_strided_slice %8 {offsets = [0, 0, 0, 0], sizes = [1, 1, 4, 32], strides = [1, 1, 1, 1]} : vector<1x4x4x32xf32> to vector<1x1x4x32xf32>
    %15 = vector.shape_cast %14 : vector<1x1x4x32xf32> to vector<1x4x32xf32>
    %16 = vector.extract_strided_slice %9 {offsets = [0, 0, 0, 0], sizes = [1, 1, 4, 32], strides = [1, 1, 1, 1]} : vector<1x4x4x32xf32> to vector<1x1x4x32xf32>
    %17 = vector.shape_cast %16 : vector<1x1x4x32xf32> to vector<1x4x32xf32>
    "tpu.trace_start"() <{level = 10 : i32, message = "bqd,bkd->bqk"}> : () -> ()
    %cst_14 = arith.constant dense<0.000000e+00> : vector<1x8x4xf32>
    %18 = tpu.matmul %13, %15, %cst_14 {dimension_numbers = #tpu.dot_dimension_numbers<[2], [2], [1], [1], [0, 0, 0, 1, 1, 1], [0], [0]>} : vector<1x8x32xf32>, vector<1x4x32xf32>, vector<1x8x4xf32> -> vector<1x8x4xf32>
    "tpu.trace_stop"() : () -> ()
    %cst_15 = arith.constant dense<0xFF800000> : vector<1x8xf32>
    %19 = vector.multi_reduction <maximumf>, %18, %cst_15 [2] : vector<1x8x4xf32> to vector<1x8xf32>
    %20 = vector.shape_cast %19 : vector<1x8xf32> to vector<1x8x1xf32>
    %21 = vector.broadcast %20 : vector<1x8x1xf32> to vector<1x8x4xf32>
    %22 = arith.subf %18, %21 : vector<1x8x4xf32>
    %23 = math.exp %22 : vector<1x8x4xf32>
    %cst_16 = arith.constant dense<0.000000e+00> : vector<1x8xf32>
    %24 = vector.multi_reduction <add>, %23, %cst_16 [2] : vector<1x8x4xf32> to vector<1x8xf32>
    %25 = vector.shape_cast %24 : vector<1x8xf32> to vector<1x8x1xf32>
    %26 = tpu.reciprocal %25 {approx = true} : vector<1x8x1xf32> -> vector<1x8x1xf32>
    %27 = vector.broadcast %26 : vector<1x8x1xf32> to vector<1x8x4xf32>
    %28 = arith.mulf %23, %27 : vector<1x8x4xf32>
    "tpu.trace_start"() <{level = 10 : i32, message = "bqk,bkd->bqd"}> : () -> ()
    %cst_17 = arith.constant dense<0.000000e+00> : vector<1x8x32xf32>
    %29 = tpu.matmul %28, %17, %cst_17 {dimension_numbers = #tpu.dot_dimension_numbers<[2], [1], [1], [2], [0, 0, 0, 1, 1, 2], [0], [0]>} : vector<1x8x4xf32>, vector<1x4x32xf32>, vector<1x8x32xf32> -> vector<1x8x32xf32>
    "tpu.trace_stop"() : () -> ()
    %c1 = arith.constant 1 : index
    %c0_18 = arith.constant 0 : index
    %c0_19 = arith.constant 0 : index
    %30 = vector.load %arg5[%c1, %c0_18, %c0_19] : memref<4x32x32xf32, #tpu.memory_space<vmem>>, vector<1x32x32xf32>
    %31 = vector.shape_cast %30 : vector<1x32x32xf32> to vector<32x32xf32>
    %cst_20 = arith.constant dense<0.000000e+00> : vector<8x32xf32>
    %32 = tpu.matmul %3, %31, %cst_20 {dimension_numbers = #tpu.dot_dimension_numbers<[1], [0], [0], [1], [0, 0, 1, 1], [], []>} : vector<8x32xf32>, vector<32x32xf32>, vector<8x32xf32> -> vector<8x32xf32>
    %33 = vector.shape_cast %32 : vector<8x32xf32> to vector<1x8x32xf32>
    %34 = vector.extract_strided_slice %8 {offsets = [0, 1, 0, 0], sizes = [1, 1, 4, 32], strides = [1, 1, 1, 1]} : vector<1x4x4x32xf32> to vector<1x1x4x32xf32>
    %35 = vector.shape_cast %34 : vector<1x1x4x32xf32> to vector<1x4x32xf32>
    %36 = vector.extract_strided_slice %9 {offsets = [0, 1, 0, 0], sizes = [1, 1, 4, 32], strides = [1, 1, 1, 1]} : vector<1x4x4x32xf32> to vector<1x1x4x32xf32>
    %37 = vector.shape_cast %36 : vector<1x1x4x32xf32> to vector<1x4x32xf32>
    "tpu.trace_start"() <{level = 10 : i32, message = "bqd,bkd->bqk"}> : () -> ()
    %cst_21 = arith.constant dense<0.000000e+00> : vector<1x8x4xf32>
    %38 = tpu.matmul %33, %35, %cst_21 {dimension_numbers = #tpu.dot_dimension_numbers<[2], [2], [1], [1], [0, 0, 0, 1, 1, 1], [0], [0]>} : vector<1x8x32xf32>, vector<1x4x32xf32>, vector<1x8x4xf32> -> vector<1x8x4xf32>
    "tpu.trace_stop"() : () -> ()
    %cst_22 = arith.constant dense<0xFF800000> : vector<1x8xf32>
    %39 = vector.multi_reduction <maximumf>, %38, %cst_22 [2] : vector<1x8x4xf32> to vector<1x8xf32>
    %40 = vector.shape_cast %39 : vector<1x8xf32> to vector<1x8x1xf32>
    %41 = vector.broadcast %40 : vector<1x8x1xf32> to vector<1x8x4xf32>
    %42 = arith.subf %38, %41 : vector<1x8x4xf32>
    %43 = math.exp %42 : vector<1x8x4xf32>
    %cst_23 = arith.constant dense<0.000000e+00> : vector<1x8xf32>
    %44 = vector.multi_reduction <add>, %43, %cst_23 [2] : vector<1x8x4xf32> to vector<1x8xf32>
    %45 = vector.shape_cast %44 : vector<1x8xf32> to vector<1x8x1xf32>
    %46 = tpu.reciprocal %45 {approx = true} : vector<1x8x1xf32> -> vector<1x8x1xf32>
    %47 = vector.broadcast %46 : vector<1x8x1xf32> to vector<1x8x4xf32>
    %48 = arith.mulf %43, %47 : vector<1x8x4xf32>
    "tpu.trace_start"() <{level = 10 : i32, message = "bqk,bkd->bqd"}> : () -> ()
    %cst_24 = arith.constant dense<0.000000e+00> : vector<1x8x32xf32>
    %49 = tpu.matmul %48, %37, %cst_24 {dimension_numbers = #tpu.dot_dimension_numbers<[2], [1], [1], [2], [0, 0, 0, 1, 1, 2], [0], [0]>} : vector<1x8x4xf32>, vector<1x4x32xf32>, vector<1x8x32xf32> -> vector<1x8x32xf32>
    "tpu.trace_stop"() : () -> ()
    %c2 = arith.constant 2 : index
    %c0_25 = arith.constant 0 : index
    %c0_26 = arith.constant 0 : index
    %50 = vector.load %arg5[%c2, %c0_25, %c0_26] : memref<4x32x32xf32, #tpu.memory_space<vmem>>, vector<1x32x32xf32>
    %51 = vector.shape_cast %50 : vector<1x32x32xf32> to vector<32x32xf32>
    %cst_27 = arith.constant dense<0.000000e+00> : vector<8x32xf32>
    %52 = tpu.matmul %3, %51, %cst_27 {dimension_numbers = #tpu.dot_dimension_numbers<[1], [0], [0], [1], [0, 0, 1, 1], [], []>} : vector<8x32xf32>, vector<32x32xf32>, vector<8x32xf32> -> vector<8x32xf32>
    %53 = vector.shape_cast %52 : vector<8x32xf32> to vector<1x8x32xf32>
    %54 = vector.extract_strided_slice %8 {offsets = [0, 2, 0, 0], sizes = [1, 1, 4, 32], strides = [1, 1, 1, 1]} : vector<1x4x4x32xf32> to vector<1x1x4x32xf32>
    %55 = vector.shape_cast %54 : vector<1x1x4x32xf32> to vector<1x4x32xf32>
    %56 = vector.extract_strided_slice %9 {offsets = [0, 2, 0, 0], sizes = [1, 1, 4, 32], strides = [1, 1, 1, 1]} : vector<1x4x4x32xf32> to vector<1x1x4x32xf32>
    %57 = vector.shape_cast %56 : vector<1x1x4x32xf32> to vector<1x4x32xf32>
    "tpu.trace_start"() <{level = 10 : i32, message = "bqd,bkd->bqk"}> : () -> ()
    %cst_28 = arith.constant dense<0.000000e+00> : vector<1x8x4xf32>
    %58 = tpu.matmul %53, %55, %cst_28 {dimension_numbers = #tpu.dot_dimension_numbers<[2], [2], [1], [1], [0, 0, 0, 1, 1, 1], [0], [0]>} : vector<1x8x32xf32>, vector<1x4x32xf32>, vector<1x8x4xf32> -> vector<1x8x4xf32>
    "tpu.trace_stop"() : () -> ()
    %cst_29 = arith.constant dense<0xFF800000> : vector<1x8xf32>
    %59 = vector.multi_reduction <maximumf>, %58, %cst_29 [2] : vector<1x8x4xf32> to vector<1x8xf32>
    %60 = vector.shape_cast %59 : vector<1x8xf32> to vector<1x8x1xf32>
    %61 = vector.broadcast %60 : vector<1x8x1xf32> to vector<1x8x4xf32>
    %62 = arith.subf %58, %61 : vector<1x8x4xf32>
    %63 = math.exp %62 : vector<1x8x4xf32>
    %cst_30 = arith.constant dense<0.000000e+00> : vector<1x8xf32>
    %64 = vector.multi_reduction <add>, %63, %cst_30 [2] : vector<1x8x4xf32> to vector<1x8xf32>
    %65 = vector.shape_cast %64 : vector<1x8xf32> to vector<1x8x1xf32>
    %66 = tpu.reciprocal %65 {approx = true} : vector<1x8x1xf32> -> vector<1x8x1xf32>
    %67 = vector.broadcast %66 : vector<1x8x1xf32> to vector<1x8x4xf32>
    %68 = arith.mulf %63, %67 : vector<1x8x4xf32>
    "tpu.trace_start"() <{level = 10 : i32, message = "bqk,bkd->bqd"}> : () -> ()
    %cst_31 = arith.constant dense<0.000000e+00> : vector<1x8x32xf32>
    %69 = tpu.matmul %68, %57, %cst_31 {dimension_numbers = #tpu.dot_dimension_numbers<[2], [1], [1], [2], [0, 0, 0, 1, 1, 2], [0], [0]>} : vector<1x8x4xf32>, vector<1x4x32xf32>, vector<1x8x32xf32> -> vector<1x8x32xf32>
    "tpu.trace_stop"() : () -> ()
    %c3 = arith.constant 3 : index
    %c0_32 = arith.constant 0 : index
    %c0_33 = arith.constant 0 : index
    %70 = vector.load %arg5[%c3, %c0_32, %c0_33] : memref<4x32x32xf32, #tpu.memory_space<vmem>>, vector<1x32x32xf32>
    %71 = vector.shape_cast %70 : vector<1x32x32xf32> to vector<32x32xf32>
    %cst_34 = arith.constant dense<0.000000e+00> : vector<8x32xf32>
    %72 = tpu.matmul %3, %71, %cst_34 {dimension_numbers = #tpu.dot_dimension_numbers<[1], [0], [0], [1], [0, 0, 1, 1], [], []>} : vector<8x32xf32>, vector<32x32xf32>, vector<8x32xf32> -> vector<8x32xf32>
    %73 = vector.shape_cast %72 : vector<8x32xf32> to vector<1x8x32xf32>
    %74 = vector.extract_strided_slice %8 {offsets = [0, 3, 0, 0], sizes = [1, 1, 4, 32], strides = [1, 1, 1, 1]} : vector<1x4x4x32xf32> to vector<1x1x4x32xf32>
    %75 = vector.shape_cast %74 : vector<1x1x4x32xf32> to vector<1x4x32xf32>
    %76 = vector.extract_strided_slice %9 {offsets = [0, 3, 0, 0], sizes = [1, 1, 4, 32], strides = [1, 1, 1, 1]} : vector<1x4x4x32xf32> to vector<1x1x4x32xf32>
    %77 = vector.shape_cast %76 : vector<1x1x4x32xf32> to vector<1x4x32xf32>
    "tpu.trace_start"() <{level = 10 : i32, message = "bqd,bkd->bqk"}> : () -> ()
    %cst_35 = arith.constant dense<0.000000e+00> : vector<1x8x4xf32>
    %78 = tpu.matmul %73, %75, %cst_35 {dimension_numbers = #tpu.dot_dimension_numbers<[2], [2], [1], [1], [0, 0, 0, 1, 1, 1], [0], [0]>} : vector<1x8x32xf32>, vector<1x4x32xf32>, vector<1x8x4xf32> -> vector<1x8x4xf32>
    "tpu.trace_stop"() : () -> ()
    %cst_36 = arith.constant dense<0xFF800000> : vector<1x8xf32>
    %79 = vector.multi_reduction <maximumf>, %78, %cst_36 [2] : vector<1x8x4xf32> to vector<1x8xf32>
    %80 = vector.shape_cast %79 : vector<1x8xf32> to vector<1x8x1xf32>
    %81 = vector.broadcast %80 : vector<1x8x1xf32> to vector<1x8x4xf32>
    %82 = arith.subf %78, %81 : vector<1x8x4xf32>
    %83 = math.exp %82 : vector<1x8x4xf32>
    %cst_37 = arith.constant dense<0.000000e+00> : vector<1x8xf32>
    %84 = vector.multi_reduction <add>, %83, %cst_37 [2] : vector<1x8x4xf32> to vector<1x8xf32>
    %85 = vector.shape_cast %84 : vector<1x8xf32> to vector<1x8x1xf32>
    %86 = tpu.reciprocal %85 {approx = true} : vector<1x8x1xf32> -> vector<1x8x1xf32>
    %87 = vector.broadcast %86 : vector<1x8x1xf32> to vector<1x8x4xf32>
    %88 = arith.mulf %83, %87 : vector<1x8x4xf32>
    "tpu.trace_start"() <{level = 10 : i32, message = "bqk,bkd->bqd"}> : () -> ()
    %cst_38 = arith.constant dense<0.000000e+00> : vector<1x8x32xf32>
    %89 = tpu.matmul %88, %77, %cst_38 {dimension_numbers = #tpu.dot_dimension_numbers<[2], [1], [1], [2], [0, 0, 0, 1, 1, 2], [0], [0]>} : vector<1x8x4xf32>, vector<1x4x32xf32>, vector<1x8x32xf32> -> vector<1x8x32xf32>
    "tpu.trace_stop"() : () -> ()
    %90 = vector.shape_cast %29 : vector<1x8x32xf32> to vector<8x32xf32>
    %c0_39 = arith.constant 0 : index
    %c0_40 = arith.constant 0 : index
    %c0_41 = arith.constant 0 : index
    %91 = vector.load %arg6[%c0_39, %c0_40, %c0_41] : memref<4x32x32xf32, #tpu.memory_space<vmem>>, vector<1x32x32xf32>
    %92 = vector.shape_cast %91 : vector<1x32x32xf32> to vector<32x32xf32>
    %cst_42 = arith.constant dense<0.000000e+00> : vector<8x32xf32>
    %93 = tpu.matmul %90, %92, %cst_42 {dimension_numbers = #tpu.dot_dimension_numbers<[1], [0], [0], [1], [0, 0, 1, 1], [], []>} : vector<8x32xf32>, vector<32x32xf32>, vector<8x32xf32> -> vector<8x32xf32>
    %94 = vector.shape_cast %49 : vector<1x8x32xf32> to vector<8x32xf32>
    %c1_43 = arith.constant 1 : index
    %c0_44 = arith.constant 0 : index
    %c0_45 = arith.constant 0 : index
    %95 = vector.load %arg6[%c1_43, %c0_44, %c0_45] : memref<4x32x32xf32, #tpu.memory_space<vmem>>, vector<1x32x32xf32>
    %96 = vector.shape_cast %95 : vector<1x32x32xf32> to vector<32x32xf32>
    %cst_46 = arith.constant dense<0.000000e+00> : vector<8x32xf32>
    %97 = tpu.matmul %94, %96, %cst_46 {dimension_numbers = #tpu.dot_dimension_numbers<[1], [0], [0], [1], [0, 0, 1, 1], [], []>} : vector<8x32xf32>, vector<32x32xf32>, vector<8x32xf32> -> vector<8x32xf32>
    %98 = arith.addf %93, %97 : vector<8x32xf32>
    %99 = vector.shape_cast %69 : vector<1x8x32xf32> to vector<8x32xf32>
    %c2_47 = arith.constant 2 : index
    %c0_48 = arith.constant 0 : index
    %c0_49 = arith.constant 0 : index
    %100 = vector.load %arg6[%c2_47, %c0_48, %c0_49] : memref<4x32x32xf32, #tpu.memory_space<vmem>>, vector<1x32x32xf32>
    %101 = vector.shape_cast %100 : vector<1x32x32xf32> to vector<32x32xf32>
    %cst_50 = arith.constant dense<0.000000e+00> : vector<8x32xf32>
    %102 = tpu.matmul %99, %101, %cst_50 {dimension_numbers = #tpu.dot_dimension_numbers<[1], [0], [0], [1], [0, 0, 1, 1], [], []>} : vector<8x32xf32>, vector<32x32xf32>, vector<8x32xf32> -> vector<8x32xf32>
    %103 = arith.addf %98, %102 : vector<8x32xf32>
    %104 = vector.shape_cast %89 : vector<1x8x32xf32> to vector<8x32xf32>
    %c3_51 = arith.constant 3 : index
    %c0_52 = arith.constant 0 : index
    %c0_53 = arith.constant 0 : index
    %105 = vector.load %arg6[%c3_51, %c0_52, %c0_53] : memref<4x32x32xf32, #tpu.memory_space<vmem>>, vector<1x32x32xf32>
    %106 = vector.shape_cast %105 : vector<1x32x32xf32> to vector<32x32xf32>
    %cst_54 = arith.constant dense<0.000000e+00> : vector<8x32xf32>
    %107 = tpu.matmul %104, %106, %cst_54 {dimension_numbers = #tpu.dot_dimension_numbers<[1], [0], [0], [1], [0, 0, 1, 1], [], []>} : vector<8x32xf32>, vector<32x32xf32>, vector<8x32xf32> -> vector<8x32xf32>
    %108 = arith.addf %103, %107 : vector<8x32xf32>
    %109 = vector.shape_cast %108 : vector<8x32xf32> to vector<1x8x32xf32>
    %110 = tpu.concatenate %109, %2 in 2 : vector<1x8x32xf32>, vector<1x8x32xf32> -> vector<1x8x64xf32>
    %c0_55 = arith.constant 0 : index
    %c0_56 = arith.constant 0 : index
    %c0_57 = arith.constant 0 : index
    %111 = vector.load %arg7[%c0_55, %c0_56, %c0_57] : memref<1x8x64xf32, #tpu.memory_space<vmem>>, vector<1x8x64xf32>
    tpu.vector_store %arg7[%c0_55, %c0_56, %c0_57], %110 {strides = array<i32>} : memref<1x8x64xf32, #tpu.memory_space<vmem>>, vector<1x8x64xf32>,
    return
  }
  func.func @transform_0(%arg0: i32) -> (i32, i32, i32) {
    %c0_i32 = arith.constant 0 : i32
    %c0_i32_0 = arith.constant 0 : i32
    %c0_i32_1 = arith.constant 0 : i32
    return %arg0, %c0_i32, %c0_i32_0 : i32, i32, i32
  }
  func.func @transform_1(%arg0: i32) -> (i32, i32, i32) {
    %c0_i32 = arith.constant 0 : i32
    %c0_i32_0 = arith.constant 0 : i32
    %c0_i32_1 = arith.constant 0 : i32
    return %arg0, %c0_i32, %c0_i32_0 : i32, i32, i32
  }
  func.func @transform_2(%arg0: i32) -> (i32, i32) {
    %c0_i32 = arith.constant 0 : i32
    %c0_i32_0 = arith.constant 0 : i32
    %c0_i32_1 = arith.constant 0 : i32
    return %c0_i32, %c0_i32_0 : i32, i32
  }
  func.func @transform_3(%arg0: i32) -> (i32, i32) {
    %c0_i32 = arith.constant 0 : i32
    %c0_i32_0 = arith.constant 0 : i32
    %c0_i32_1 = arith.constant 0 : i32
    return %c0_i32, %c0_i32_0 : i32, i32
  }
  func.func @transform_4(%arg0: i32) -> (i32, i32, i32) {
    %c0_i32 = arith.constant 0 : i32
    %c0_i32_0 = arith.constant 0 : i32
    %c0_i32_1 = arith.constant 0 : i32
    %c0_i32_2 = arith.constant 0 : i32
    return %c0_i32, %c0_i32_0, %c0_i32_1 : i32, i32, i32
  }
  func.func @transform_5(%arg0: i32) -> (i32, i32, i32) {
    %c0_i32 = arith.constant 0 : i32
    %c0_i32_0 = arith.constant 0 : i32
    %c0_i32_1 = arith.constant 0 : i32
    %c0_i32_2 = arith.constant 0 : i32
    return %c0_i32, %c0_i32_0, %c0_i32_1 : i32, i32, i32
  }
  func.func @transform_6(%arg0: i32) -> (i32, i32, i32) {
    %c0_i32 = arith.constant 0 : i32
    %c0_i32_0 = arith.constant 0 : i32
    %c0_i32_1 = arith.constant 0 : i32
    return %arg0, %c0_i32, %c0_i32_0 : i32, i32, i32
  }
}

module attributes {stable_mosaic.version = 11 : i64} {
  func.func @_fuse_kernel(%arg0: i32, %arg1: memref<1x16x32xf32, #tpu.memory_space<vmem>>, %arg2: memref<1x8x32xf32, #tpu.memory_space<vmem>>, %arg3: memref<32x32xf32, #tpu.memory_space<vmem>>, %arg4: memref<32x32xf32, #tpu.memory_space<vmem>>, %arg5: memref<4x32x32xf32, #tpu.memory_space<vmem>>, %arg6: memref<4x32x32xf32, #tpu.memory_space<vmem>>, %arg7: memref<1x8x64xf32, #tpu.memory_space<vmem>>) attributes {dimension_semantics = [#tpu.dimension_semantics<parallel>], iteration_bounds = array<i64: 2>, scalar_prefetch = 0 : i64, scratch_operands = 0 : i64, tpu.core_type = #tpu.core_type<tc>, window_params = [{transform_indices = @transform_0, window_bounds = array<i64: 1, 16, 32>}, {transform_indices = @transform_1, window_bounds = array<i64: 1, 8, 32>}, {pipeline_mode = #tpu.pipeline_mode<synchronous>, transform_indices = @transform_2, window_bounds = array<i64: 32, 32>}, {pipeline_mode = #tpu.pipeline_mode<synchronous>, transform_indices = @transform_3, window_bounds = array<i64: 32, 32>}, {pipeline_mode = #tpu.pipeline_mode<synchronous>, transform_indices = @transform_4, window_bounds = array<i64: 4, 32, 32>}, {pipeline_mode = #tpu.pipeline_mode<synchronous>, transform_indices = @transform_5, window_bounds = array<i64: 4, 32, 32>}, {transform_indices = @transform_6, window_bounds = array<i64: 1, 8, 64>}]} {
    %c0 = arith.constant 0 : index
    %c0_0 = arith.constant 0 : index
    %c0_1 = arith.constant 0 : index
    %0 = vector.load %arg1[%c0, %c0_0, %c0_1] : memref<1x16x32xf32, #tpu.memory_space<vmem>>, vector<1x16x32xf32>
    %1 = vector.shape_cast %0 : vector<1x16x32xf32> to vector<16x32xf32>
    %c0_2 = arith.constant 0 : index
    %c0_3 = arith.constant 0 : index
    %c0_4 = arith.constant 0 : index
    %2 = vector.load %arg2[%c0_2, %c0_3, %c0_4] : memref<1x8x32xf32, #tpu.memory_space<vmem>>, vector<1x8x32xf32>
    %3 = vector.shape_cast %2 : vector<1x8x32xf32> to vector<8x32xf32>
    %c0_5 = arith.constant 0 : index
    %c0_6 = arith.constant 0 : index
    %4 = vector.load %arg3[%c0_5, %c0_6] : memref<32x32xf32, #tpu.memory_space<vmem>>, vector<32x32xf32>
    %cst = arith.constant dense<0.000000e+00> : vector<16x32xf32>
    %5 = tpu.matmul %1, %4, %cst {dimension_numbers = #tpu.dot_dimension_numbers<[1], [0], [0], [1], [0, 0, 1, 1], [], []>} : vector<16x32xf32>, vector<32x32xf32>, vector<16x32xf32> -> vector<16x32xf32>
    %c0_7 = arith.constant 0 : index
    %c0_8 = arith.constant 0 : index
    %6 = vector.load %arg4[%c0_7, %c0_8] : memref<32x32xf32, #tpu.memory_space<vmem>>, vector<32x32xf32>
    %cst_9 = arith.constant dense<0.000000e+00> : vector<16x32xf32>
    %7 = tpu.matmul %1, %6, %cst_9 {dimension_numbers = #tpu.dot_dimension_numbers<[1], [0], [0], [1], [0, 0, 1, 1], [], []>} : vector<16x32xf32>, vector<32x32xf32>, vector<16x32xf32> -> vector<16x32xf32>
    %8 = vector.shape_cast %5 : vector<16x32xf32> to vector<1x4x4x32xf32>
    %9 = vector.shape_cast %7 : vector<16x32xf32> to vector<1x4x4x32xf32>
    %c0_10 = arith.constant 0 : index
    %c0_11 = arith.constant 0 : index
    %c0_12 = arith.constant 0 : index
    %10 = vector.load %arg5[%c0_10, %c0_11, %c0_12] : memref<4x32x32xf32, #tpu.memory_space<vmem>>, vector<1x32x32xf32>
    %11 = vector.shape_cast %10 : vector<1x32x32xf32> to vector<32x32xf32>
    %cst_13 = arith.constant dense<0.000000e+00> : vector<8x32xf32>
    %12 = tpu.matmul %3, %11, %cst_13 {dimension_numbers = #tpu.dot_dimension_numbers<[1], [0], [0], [1], [0, 0, 1, 1], [], []>} : vector<8x32xf32>, vector<32x32xf32>, vector<8x32xf32> -> vector<8x32xf32>
    %13 = vector.shape_cast %12 : vector<8x32xf32> to vector<1x8x32xf32>
    %14 = vector.extract_strided_slice %8 {offsets = [0, 0, 0, 0], sizes = [1, 1, 4, 32], strides = [1, 1, 1, 1]} : vector<1x4x4x32xf32> to vector<1x1x4x32xf32>
    %15 = vector.shape_cast %14 : vector<1x1x4x32xf32> to vector<1x4x32xf32>
    %16 = vector.extract_strided_slice %9 {offsets = [0, 0, 0, 0], sizes = [1, 1, 4, 32], strides = [1, 1, 1, 1]} : vector<1x4x4x32xf32> to vector<1x1x4x32xf32>
    %17 = vector.shape_cast %16 : vector<1x1x4x32xf32> to vector<1x4x32xf32>
    "tpu.trace_start"() <{level = 10 : i32, message = "bqd,bkd->bqk"}> : () -> ()
    %cst_14 = arith.constant dense<0.000000e+00> : vector<1x8x4xf32>
    %18 = tpu.matmul %13, %15, %cst_14 {dimension_numbers = #tpu.dot_dimension_numbers<[2], [2], [1], [1], [0, 0, 0, 1, 1, 1], [0], [0]>} : vector<1x8x32xf32>, vector<1x4x32xf32>, vector<1x8x4xf32> -> vector<1x8x4xf32>
    "tpu.trace_stop"() : () -> ()
    %cst_15 = arith.constant dense<0xFF800000> : vector<1x8xf32>
    %19 = vector.multi_reduction <maximumf>, %18, %cst_15 [2] : vector<1x8x4xf32> to vector<1x8xf32>
    %20 = vector.shape_cast %19 : vector<1x8xf32> to vector<1x8x1xf32>
    %21 = vector.broadcast %20 : vector<1x8x1xf32> to vector<1x8x4xf32>
    %22 = arith.subf %18, %21 : vector<1x8x4xf32>
    %23 = math.exp %22 : vector<1x8x4xf32>
    %cst_16 = arith.constant dense<0.000000e+00> : vector<1x8xf32>
    %24 = vector.multi_reduction <add>, %23, %cst_16 [2] : vector<1x8x4xf32> to vector<1x8xf32>
    %25 = vector.shape_cast %24 : vector<1x8xf32> to vector<1x8x1xf32>
    %26 = tpu.reciprocal %25 {approx = true} : vector<1x8x1xf32> -> vector<1x8x1xf32>
    %27 = vector.broadcast %26 : vector<1x8x1xf32> to vector<1x8x4xf32>
    %28 = arith.mulf %23, %27 : vector<1x8x4xf32>
    "tpu.trace_start"() <{level = 10 : i32, message = "bqk,bkd->bqd"}> : () -> ()
    %cst_17 = arith.constant dense<0.000000e+00> : vector<1x8x32xf32>
    %29 = tpu.matmul %28, %17, %cst_17 {dimension_numbers = #tpu.dot_dimension_numbers<[2], [1], [1], [2], [0, 0, 0, 1, 1, 2], [0], [0]>} : vector<1x8x4xf32>, vector<1x4x32xf32>, vector<1x8x32xf32> -> vector<1x8x32xf32>
    "tpu.trace_stop"() : () -> ()
    %c1 = arith.constant 1 : index
    %c0_18 = arith.constant 0 : index
    %c0_19 = arith.constant 0 : index
    %30 = vector.load %arg5[%c1, %c0_18, %c0_19] : memref<4x32x32xf32, #tpu.memory_space<vmem>>, vector<1x32x32xf32>
    %31 = vector.shape_cast %30 : vector<1x32x32xf32> to vector<32x32xf32>
    %cst_20 = arith.constant dense<0.000000e+00> : vector<8x32xf32>
    %32 = tpu.matmul %3, %31, %cst_20 {dimension_numbers = #tpu.dot_dimension_numbers<[1], [0], [0], [1], [0, 0, 1, 1], [], []>} : vector<8x32xf32>, vector<32x32xf32>, vector<8x32xf32> -> vector<8x32xf32>
    %33 = vector.shape_cast %32 : vector<8x32xf32> to vector<1x8x32xf32>
    %34 = vector.extract_strided_slice %8 {offsets = [0, 1, 0, 0], sizes = [1, 1, 4, 32], strides = [1, 1, 1, 1]} : vector<1x4x4x32xf32> to vector<1x1x4x32xf32>
    %35 = vector.shape_cast %34 : vector<1x1x4x32xf32> to vector<1x4x32xf32>
    %36 = vector.extract_strided_slice %9 {offsets = [0, 1, 0, 0], sizes = [1, 1, 4, 32], strides = [1, 1, 1, 1]} : vector<1x4x4x32xf32> to vector<1x1x4x32xf32>
    %37 = vector.shape_cast %36 : vector<1x1x4x32xf32> to vector<1x4x32xf32>
    "tpu.trace_start"() <{level = 10 : i32, message = "bqd,bkd->bqk"}> : () -> ()
    %cst_21 = arith.constant dense<0.000000e+00> : vector<1x8x4xf32>
    %38 = tpu.matmul %33, %35, %cst_21 {dimension_numbers = #tpu.dot_dimension_numbers<[2], [2], [1], [1], [0, 0, 0, 1, 1, 1], [0], [0]>} : vector<1x8x32xf32>, vector<1x4x32xf32>, vector<1x8x4xf32> -> vector<1x8x4xf32>
    "tpu.trace_stop"() : () -> ()
    %cst_22 = arith.constant dense<0xFF800000> : vector<1x8xf32>
    %39 = vector.multi_reduction <maximumf>, %38, %cst_22 [2] : vector<1x8x4xf32> to vector<1x8xf32>
    %40 = vector.shape_cast %39 : vector<1x8xf32> to vector<1x8x1xf32>
    %41 = vector.broadcast %40 : vector<1x8x1xf32> to vector<1x8x4xf32>
    %42 = arith.subf %38, %41 : vector<1x8x4xf32>
    %43 = math.exp %42 : vector<1x8x4xf32>
    %cst_23 = arith.constant dense<0.000000e+00> : vector<1x8xf32>
    %44 = vector.multi_reduction <add>, %43, %cst_23 [2] : vector<1x8x4xf32> to vector<1x8xf32>
    %45 = vector.shape_cast %44 : vector<1x8xf32> to vector<1x8x1xf32>
    %46 = tpu.reciprocal %45 {approx = true} : vector<1x8x1xf32> -> vector<1x8x1xf32>
    %47 = vector.broadcast %46 : vector<1x8x1xf32> to vector<1x8x4xf32>
    %48 = arith.mulf %43, %47 : vector<1x8x4xf32>
    "tpu.trace_start"() <{level = 10 : i32, message = "bqk,bkd->bqd"}> : () -> ()
    %cst_24 = arith.constant dense<0.000000e+00> : vector<1x8x32xf32>
    %49 = tpu.matmul %48, %37, %cst_24 {dimension_numbers = #tpu.dot_dimension_numbers<[2], [1], [1], [2], [0, 0, 0, 1, 1, 2], [0], [0]>} : vector<1x8x4xf32>, vector<1x4x32xf32>, vector<1x8x32xf32> -> vector<1x8x32xf32>
    "tpu.trace_stop"() : () -> ()
    %c2 = arith.constant 2 : index
    %c0_25 = arith.constant 0 : index
    %c0_26 = arith.constant 0 : index
    %50 = vector.load %arg5[%c2, %c0_25, %c0_26] : memref<4x32x32xf32, #tpu.memory_space<vmem>>, vector<1x32x32xf32>
    %51 = vector.shape_cast %50 : vector<1x32x32xf32> to vector<32x32xf32>
    %cst_27 = arith.constant dense<0.000000e+00> : vector<8x32xf32>
    %52 = tpu.matmul %3, %51, %cst_27 {dimension_numbers = #tpu.dot_dimension_numbers<[1], [0], [0], [1], [0, 0, 1, 1], [], []>} : vector<8x32xf32>, vector<32x32xf32>, vector<8x32xf32> -> vector<8x32xf32>
    %53 = vector.shape_cast %52 : vector<8x32xf32> to vector<1x8x32xf32>
    %54 = vector.extract_strided_slice %8 {offsets = [0, 2, 0, 0], sizes = [1, 1, 4, 32], strides = [1, 1, 1, 1]} : vector<1x4x4x32xf32> to vector<1x1x4x32xf32>
    %55 = vector.shape_cast %54 : vector<1x1x4x32xf32> to vector<1x4x32xf32>
    %56 = vector.extract_strided_slice %9 {offsets = [0, 2, 0, 0], sizes = [1, 1, 4, 32], strides = [1, 1, 1, 1]} : vector<1x4x4x32xf32> to vector<1x1x4x32xf32>
    %57 = vector.shape_cast %56 : vector<1x1x4x32xf32> to vector<1x4x32xf32>
    "tpu.trace_start"() <{level = 10 : i32, message = "bqd,bkd->bqk"}> : () -> ()
    %cst_28 = arith.constant dense<0.000000e+00> : vector<1x8x4xf32>
    %58 = tpu.matmul %53, %55, %cst_28 {dimension_numbers = #tpu.dot_dimension_numbers<[2], [2], [1], [1], [0, 0, 0, 1, 1, 1], [0], [0]>} : vector<1x8x32xf32>, vector<1x4x32xf32>, vector<1x8x4xf32> -> vector<1x8x4xf32>
    "tpu.trace_stop"() : () -> ()
    %cst_29 = arith.constant dense<0xFF800000> : vector<1x8xf32>
    %59 = vector.multi_reduction <maximumf>, %58, %cst_29 [2] : vector<1x8x4xf32> to vector<1x8xf32>
    %60 = vector.shape_cast %59 : vector<1x8xf32> to vector<1x8x1xf32>
    %61 = vector.broadcast %60 : vector<1x8x1xf32> to vector<1x8x4xf32>
    %62 = arith.subf %58, %61 : vector<1x8x4xf32>
    %63 = math.exp %62 : vector<1x8x4xf32>
    %cst_30 = arith.constant dense<0.000000e+00> : vector<1x8xf32>
    %64 = vector.multi_reduction <add>, %63, %cst_30 [2] : vector<1x8x4xf32> to vector<1x8xf32>
    %65 = vector.shape_cast %64 : vector<1x8xf32> to vector<1x8x1xf32>
    %66 = tpu.reciprocal %65 {approx = true} : vector<1x8x1xf32> -> vector<1x8x1xf32>
    %67 = vector.broadcast %66 : vector<1x8x1xf32> to vector<1x8x4xf32>
    %68 = arith.mulf %63, %67 : vector<1x8x4xf32>
    "tpu.trace_start"() <{level = 10 : i32, message = "bqk,bkd->bqd"}> : () -> ()
    %cst_31 = arith.constant dense<0.000000e+00> : vector<1x8x32xf32>
    %69 = tpu.matmul %68, %57, %cst_31 {dimension_numbers = #tpu.dot_dimension_numbers<[2], [1], [1], [2], [0, 0, 0, 1, 1, 2], [0], [0]>} : vector<1x8x4xf32>, vector<1x4x32xf32>, vector<1x8x32xf32> -> vector<1x8x32xf32>
    "tpu.trace_stop"() : () -> ()
    %c3 = arith.constant 3 : index
    %c0_32 = arith.constant 0 : index
    %c0_33 = arith.constant 0 : index
    %70 = vector.load %arg5[%c3, %c0_32, %c0_33] : memref<4x32x32xf32, #tpu.memory_space<vmem>>, vector<1x32x32xf32>
    %71 = vector.shape_cast %70 : vector<1x32x32xf32> to vector<32x32xf32>
    %cst_34 = arith.constant dense<0.000000e+00> : vector<8x32xf32>
    %72 = tpu.matmul %3, %71, %cst_34 {dimension_numbers = #tpu.dot_dimension_numbers<[1], [0], [0], [1], [0, 0, 1, 1], [], []>} : vector<8x32xf32>, vector<32x32xf32>, vector<8x32xf32> -> vector<8x32xf32>
    %73 = vector.shape_cast %72 : vector<8x32xf32> to vector<1x8x32xf32>
    %74 = vector.extract_strided_slice %8 {offsets = [0, 3, 0, 0], sizes = [1, 1, 4, 32], strides = [1, 1, 1, 1]} : vector<1x4x4x32xf32> to vector<1x1x4x32xf32>
    %75 = vector.shape_cast %74 : vector<1x1x4x32xf32> to vector<1x4x32xf32>
    %76 = vector.extract_strided_slice %9 {offsets = [0, 3, 0, 0], sizes = [1, 1, 4, 32], strides = [1, 1, 1, 1]} : vector<1x4x4x32xf32> to vector<1x1x4x32xf32>
    %77 = vector.shape_cast %76 : vector<1x1x4x32xf32> to vector<1x4x32xf32>
    "tpu.trace_start"() <{level = 10 : i32, message = "bqd,bkd->bqk"}> : () -> ()
    %cst_35 = arith.constant dense<0.000000e+00> : vector<1x8x4xf32>
    %78 = tpu.matmul %73, %75, %cst_35 {dimension_numbers = #tpu.dot_dimension_numbers<[2], [2], [1], [1], [0, 0, 0, 1, 1, 1], [0], [0]>} : vector<1x8x32xf32>, vector<1x4x32xf32>, vector<1x8x4xf32> -> vector<1x8x4xf32>
    "tpu.trace_stop"() : () -> ()
    %cst_36 = arith.constant dense<0xFF800000> : vector<1x8xf32>
    %79 = vector.multi_reduction <maximumf>, %78, %cst_36 [2] : vector<1x8x4xf32> to vector<1x8xf32>
    %80 = vector.shape_cast %79 : vector<1x8xf32> to vector<1x8x1xf32>
    %81 = vector.broadcast %80 : vector<1x8x1xf32> to vector<1x8x4xf32>
    %82 = arith.subf %78, %81 : vector<1x8x4xf32>
    %83 = math.exp %82 : vector<1x8x4xf32>
    %cst_37 = arith.constant dense<0.000000e+00> : vector<1x8xf32>
    %84 = vector.multi_reduction <add>, %83, %cst_37 [2] : vector<1x8x4xf32> to vector<1x8xf32>
    %85 = vector.shape_cast %84 : vector<1x8xf32> to vector<1x8x1xf32>
    %86 = tpu.reciprocal %85 {approx = true} : vector<1x8x1xf32> -> vector<1x8x1xf32>
    %87 = vector.broadcast %86 : vector<1x8x1xf32> to vector<1x8x4xf32>
    %88 = arith.mulf %83, %87 : vector<1x8x4xf32>
    "tpu.trace_start"() <{level = 10 : i32, message = "bqk,bkd->bqd"}> : () -> ()
    %cst_38 = arith.constant dense<0.000000e+00> : vector<1x8x32xf32>
    %89 = tpu.matmul %88, %77, %cst_38 {dimension_numbers = #tpu.dot_dimension_numbers<[2], [1], [1], [2], [0, 0, 0, 1, 1, 2], [0], [0]>} : vector<1x8x4xf32>, vector<1x4x32xf32>, vector<1x8x32xf32> -> vector<1x8x32xf32>
    "tpu.trace_stop"() : () -> ()
    %90 = vector.shape_cast %29 : vector<1x8x32xf32> to vector<8x32xf32>
    %c0_39 = arith.constant 0 : index
    %c0_40 = arith.constant 0 : index
    %c0_41 = arith.constant 0 : index
    %91 = vector.load %arg6[%c0_39, %c0_40, %c0_41] : memref<4x32x32xf32, #tpu.memory_space<vmem>>, vector<1x32x32xf32>
    %92 = vector.shape_cast %91 : vector<1x32x32xf32> to vector<32x32xf32>
    %cst_42 = arith.constant dense<0.000000e+00> : vector<8x32xf32>
    %93 = tpu.matmul %90, %92, %cst_42 {dimension_numbers = #tpu.dot_dimension_numbers<[1], [0], [0], [1], [0, 0, 1, 1], [], []>} : vector<8x32xf32>, vector<32x32xf32>, vector<8x32xf32> -> vector<8x32xf32>
    %94 = vector.shape_cast %49 : vector<1x8x32xf32> to vector<8x32xf32>
    %c1_43 = arith.constant 1 : index
    %c0_44 = arith.constant 0 : index
    %c0_45 = arith.constant 0 : index
    %95 = vector.load %arg6[%c1_43, %c0_44, %c0_45] : memref<4x32x32xf32, #tpu.memory_space<vmem>>, vector<1x32x32xf32>
    %96 = vector.shape_cast %95 : vector<1x32x32xf32> to vector<32x32xf32>
    %cst_46 = arith.constant dense<0.000000e+00> : vector<8x32xf32>
    %97 = tpu.matmul %94, %96, %cst_46 {dimension_numbers = #tpu.dot_dimension_numbers<[1], [0], [0], [1], [0, 0, 1, 1], [], []>} : vector<8x32xf32>, vector<32x32xf32>, vector<8x32xf32> -> vector<8x32xf32>
    %98 = arith.addf %93, %97 : vector<8x32xf32>
    %99 = vector.shape_cast %69 : vector<1x8x32xf32> to vector<8x32xf32>
    %c2_47 = arith.constant 2 : index
    %c0_48 = arith.constant 0 : index
    %c0_49 = arith.constant 0 : index
    %100 = vector.load %arg6[%c2_47, %c0_48, %c0_49] : memref<4x32x32xf32, #tpu.memory_space<vmem>>, vector<1x32x32xf32>
    %101 = vector.shape_cast %100 : vector<1x32x32xf32> to vector<32x32xf32>
    %cst_50 = arith.constant dense<0.000000e+00> : vector<8x32xf32>
    %102 = tpu.matmul %99, %101, %cst_50 {dimension_numbers = #tpu.dot_dimension_numbers<[1], [0], [0], [1], [0, 0, 1, 1], [], []>} : vector<8x32xf32>, vector<32x32xf32>, vector<8x32xf32> -> vector<8x32xf32>
    %103 = arith.addf %98, %102 : vector<8x32xf32>
    %104 = vector.shape_cast %89 : vector<1x8x32xf32> to vector<8x32xf32>
    %c3_51 = arith.constant 3 : index
    %c0_52 = arith.constant 0 : index
    %c0_53 = arith.constant 0 : index
    %105 = vector.load %arg6[%c3_51, %c0_52, %c0_53] : memref<4x32x32xf32, #tpu.memory_space<vmem>>, vector<1x32x32xf32>
    %106 = vector.shape_cast %105 : vector<1x32x32xf32> to vector<32x32xf32>
    %cst_54 = arith.constant dense<0.000000e+00> : vector<8x32xf32>
    %107 = tpu.matmul %104, %106, %cst_54 {dimension_numbers = #tpu.dot_dimension_numbers<[1], [0], [0], [1], [0, 0, 1, 1], [], []>} : vector<8x32xf32>, vector<32x32xf32>, vector<8x32xf32> -> vector<8x32xf32>
    %108 = arith.addf %103, %107 : vector<8x32xf32>
    %109 = vector.shape_cast %108 : vector<8x32xf32> to vector<1x8x32xf32>
    %110 = tpu.concatenate %109, %2 in 2 : vector<1x8x32xf32>, vector<1x8x32xf32> -> vector<1x8x64xf32>
    %c0_55 = arith.constant 0 : index
    %c0_56 = arith.constant 0 : index
    %c0_57 = arith.constant 0 : index
    %111 = vector.load %arg7[%c0_55, %c0_56, %c0_57] : memref<1x8x64xf32, #tpu.memory_space<vmem>>, vector<1x8x64xf32>
    tpu.vector_store %arg7[%c0_55, %c0_56, %c0_57], %110 {strides = array<i32>} : memref<1x8x64xf32, #tpu.memory_space<vmem>>, vector<1x8x64xf32>,
    return
  }
  func.func @transform_0(%arg0: i32) -> (i32, i32, i32) {
    %c0_i32 = arith.constant 0 : i32
    %c0_i32_0 = arith.constant 0 : i32
    %c0_i32_1 = arith.constant 0 : i32
    return %arg0, %c0_i32, %c0_i32_0 : i32, i32, i32
  }
  func.func @transform_1(%arg0: i32) -> (i32, i32, i32) {
    %c0_i32 = arith.constant 0 : i32
    %c0_i32_0 = arith.constant 0 : i32
    %c0_i32_1 = arith.constant 0 : i32
    return %arg0, %c0_i32, %c0_i32_0 : i32, i32, i32
  }
  func.func @transform_2(%arg0: i32) -> (i32, i32) {
    %c0_i32 = arith.constant 0 : i32
    %c0_i32_0 = arith.constant 0 : i32
    %c0_i32_1 = arith.constant 0 : i32
    return %c0_i32, %c0_i32_0 : i32, i32
  }
  func.func @transform_3(%arg0: i32) -> (i32, i32) {
    %c0_i32 = arith.constant 0 : i32
    %c0_i32_0 = arith.constant 0 : i32
    %c0_i32_1 = arith.constant 0 : i32
    return %c0_i32, %c0_i32_0 : i32, i32
  }
  func.func @transform_4(%arg0: i32) -> (i32, i32, i32) {
    %c0_i32 = arith.constant 0 : i32
    %c0_i32_0 = arith.constant 0 : i32
    %c0_i32_1 = arith.constant 0 : i32
    %c0_i32_2 = arith.constant 0 : i32
    return %c0_i32, %c0_i32_0, %c0_i32_1 : i32, i32, i32
  }
  func.func @transform_5(%arg0: i32) -> (i32, i32, i32) {
    %c0_i32 = arith.constant 0 : i32
    %c0_i32_0 = arith.constant 0 : i32
    %c0_i32_1 = arith.constant 0 : i32
    %c0_i32_2 = arith.constant 0 : i32
    return %c0_i32, %c0_i32_0, %c0_i32_1 : i32, i32, i32
  }
  func.func @transform_6(%arg0: i32) -> (i32, i32, i32) {
    %c0_i32 = arith.constant 0 : i32
    %c0_i32_0 = arith.constant 0 : i32
    %c0_i32_1 = arith.constant 0 : i32
    return %arg0, %c0_i32, %c0_i32_0 : i32, i32, i32
  }
}

</mosaic_0001>

<bundles_post_ra>
// kernel: tpu_custom_call.1
= control target key start
LH: loop header
LB: loop body
LE: loop exit
PB: predicated region body
PF: predicated region fallthrough
CT: control target
= control target key end

     0   :  { %s3170_s0 = inlined_call_operand.hbm [shape: f32[2,16,32], index: 0, kind: input, shape index: {}]   ;;  %s3171_s1 = inlined_call_operand.hbm [shape: f32[2,8,32], index: 1, kind: input, shape index: {}]   ;;  %s3172_s2 = inlined_call_operand.hbm [shape: f32[32,32], index: 2, kind: input, shape index: {}]   ;;  %s3173_s3 = inlined_call_operand.hbm [shape: f32[32,32], index: 3, kind: input, shape index: {}]   ;;  %s3174_s4 = inlined_call_operand.hbm [shape: f32[4,32,32], index: 4, kind: input, shape index: {}]   ;;  %s3175_s5 = inlined_call_operand.hbm [shape: f32[4,32,32], index: 5, kind: input, shape index: {}]   ;;  %s3176_s6 = inlined_call_operand.hbm [shape: f32[2,8,64], index: 6, kind: output, shape index: {}]  }
   0x1   :  { %3183 = sst [smem:[#allocation20_spill]] %s3170_s0 }
   0x2   :  { %3184 = sst [smem:[#allocation21_spill]] %s3172_s2 }
   0x3   :  { %3185 = sst [smem:[#allocation22_spill]] %s3173_s3 }
   0x4   :  { %3186 = sst [smem:[#allocation23_spill]] %s3174_s4 }
   0x5   :  { %11 = vsyncpa [#allocation3], 0 }
   0x6   :  { %13 = vsyncpa [#allocation3 + $0x1], 0 }
   0x7   :  { %14 = vsyncpa [#allocation6], 0 }
   0x8   :  { %16 = vsyncpa [#allocation6 + $0x1], 0 }
   0x9   :  { %17 = vsyncpa [#allocation9], 0 }
   0xa   :  { %18 = vsyncpa [#allocation12], 0 }
   0xb   :  { %19 = vsyncpa [#allocation4], 0 }
   0xc   :  { %21 = vsyncpa [#allocation4 + $0x1], 0  ;;  %s2712_s21 = smov 0   ;;  %s2714_s22 = smov 0  }
   0xd   :  { %s2716_s23 = smov 0   ;;  %s2718_s24 = smov 0  }
   0xe LB: > { %s2733_s25 = sadd.s32 4294967295, %s2662_s24   ;;  %s1953_s26 = sadd.s32 4294967294, %s2662_s24   ;;  %s2662_s24 = sphi %s2718_s24, %s3216_s24   ;;  %s2658_s23 = sphi %s2716_s23, %s3215_s23   ;;  %s2654_s22 = sphi %s2714_s22, %s3214_s22   ;;  %s2650_s21 = sphi %s2712_s21, %s3213_s21  }
   0xf   : > { %p47_p0 = scmp.ne.s32.totalorder %s2654_s22, %s2650_s21  ;;  %p3177_p1 = scmp.eq.s32.totalorder %s2733_s25, 0 }
  0x10   : > { %p187_p3 = scmp.eq.s32.totalorder %s1953_s26, 1  ;;  %p1954_p5 = scmp.ge.s32.totalorder %s2662_s24, 1 }
  0x11   : > { %p2742_p4 = por %p3177_p1, %p47_p0  ;;  %p194_p7 = scmp.lt.s32.totalorder %s2662_s24, 3 }
  0x12   : > { %p2747_p6 = por %p187_p3, %p47_p0  ;;  %s2664_s30 = smov [#allocation7]  }
  0x13   : > { %s3187_s27 = scalar_select %p2742_p4, 1, 0 }
  0x14   : > { %s3188_s28 = scalar_select %p2747_p6, 1, 0 }
  0x15   : > { %p2752_p8 = pnand %p1954_p5, %p194_p7  ;;  %s206_s7 = sshll.u32 %s2664_s30, 4  ;;  %s2756_s7 = int_to_ptr.vmem [resolvable:$true] %s206_s7 }
  0x16   : > { %s2665_s9 = smov [#allocation8]   ;;  %s2666_s11 = smov [#allocation10]  }
  0x17   : > { %s3189_s29 = scalar_select %p2752_p8, 1, 0 }
  0x18   : > { %p2316_p9 = pneg %p2752_p8  ;;  %s219_s10 = sshll.u32 %s2665_s9, 4  ;;  %s2767_s10 = int_to_ptr.vmem [resolvable:$true] %s219_s10 }
  0x19   : > { %s2769_s12 = sshll.u32 %s2666_s11, 4  ;;  %s3191_s2 = sld [smem:[#allocation21_spill]]  ;;  %s233_s12 = int_to_ptr.vmem [resolvable:$true] %s2769_s12 }
  0x1a   : > { %p2763_p11 = pnand %p2316_p9, %p3177_p1 }
  0x1c   : > { %p2779_p13 = pneg %p2763_p11 }
  0x1f   : > { %s2408_s15 = scalar_lea.hbm %s3191_s2, 512 }
  0x20   : > { %p2409_p12 = scmp.ne.s32.totalorder %s3191_s2, %s2408_s15  ;;  %p2415_p5 = scmp.lt.u32.totalorder %s2408_s15, %s3191_s2 }
  0x22   : > { %p2411_p0 = pnand %p2779_p13, %p2409_p12 }
  0x24   : > { %p2412_p3 = pneg %p2411_p0 }
  0x26   : > { %p2417_p7 = pnand %p2415_p5, %p2412_p3 }
  0x28   : > { %2420 = shalt.err (!%p2417_p7)
}
  0x29   : > { %s2421_s26 = scalar_lea.vmem %s2756_s7, 512  ;;  %p2429_p2 = scmp.lt.s32.totalorder %s2756_s7, %s2756_s7 }
  0x2a   : > { %p2422_p9 = scmp.ne.s32.totalorder %s2756_s7, %s2421_s26  ;;  %p2430_p6 = scmp.lt.s32.totalorder %s2421_s26, %s2421_s26 }
  0x2c   : > { %p2424_p10 = pnand %p2422_p9, %p2779_p13  ;;  %p2431_p12 = por %p2430_p6, %p2429_p2 }
  0x2e   : > { %p2425_p1 = pneg %p2424_p10 }
  0x30   : > { %p2432_p0 = pnand %p2431_p12, %p2425_p1 }
  0x32   : > { %2435 = shalt.err (!%p2432_p0)
}
  0x33   : > { %s3180_s30 = smov 128   ;;  %s3181_s9 = smov 8  }
  0x34   : > { %2319 = dma.hbm_to_vmem [thread:$0]  (!%p2763_p11), %s3191_s2, 512, %s2756_s7, [#allocation6], %s3180_s30, %s3180_s30, %s3181_s9  }
  0x35   : > { %s3193_s3 = sld [smem:[#allocation22_spill]] }
  0x3b   : > { %s2436_s16 = scalar_lea.hbm %s3193_s3, 512 }
  0x3c   : > { %p2437_p1 = scmp.ne.s32.totalorder %s3193_s3, %s2436_s16  ;;  %p2443_p10 = scmp.lt.u32.totalorder %s2436_s16, %s3193_s3 }
  0x3e   : > { %p2439_p2 = pnand %p2437_p1, %p2779_p13 }
  0x40   : > { %p2440_p6 = pneg %p2439_p2 }
  0x42   : > { %p2445_p3 = pnand %p2443_p10, %p2440_p6 }
  0x44   : > { %2448 = shalt.err (!%p2445_p3)
}
  0x45   : > { %s2449_s7 = scalar_lea.vmem %s2767_s10, 512  ;;  %p2457_p12 = scmp.lt.s32.totalorder %s2767_s10, %s2767_s10 }
  0x46   : > { %p2450_p5 = scmp.ne.s32.totalorder %s2767_s10, %s2449_s7  ;;  %p2458_p0 = scmp.lt.s32.totalorder %s2449_s7, %s2449_s7 }
  0x48   : > { %p2452_p7 = pnand %p2450_p5, %p2779_p13  ;;  %p2459_p1 = por %p2458_p0, %p2457_p12 }
  0x4a   : > { %p2453_p9 = pneg %p2452_p7 }
  0x4c   : > { %p2460_p2 = pnand %p2459_p1, %p2453_p9 }
  0x4e   : > { %2463 = shalt.err (!%p2460_p2)
}
  0x4f   : > { %2322 = dma.hbm_to_vmem [thread:$0]  (!%p2763_p11), %s3193_s3, 512, %s2767_s10, [#allocation9], %s3180_s30, %s3180_s30, %s3181_s9  }
  0x50   : > { %s3194_s4 = sld [smem:[#allocation23_spill]] }
  0x56   : > { %s2464_s16 = scalar_lea.hbm %s3194_s4, 2048 }
  0x57   : > { %p2465_p6 = scmp.ne.s32.totalorder %s3194_s4, %s2464_s16  ;;  %p2471_p5 = scmp.lt.u32.totalorder %s2464_s16, %s3194_s4 }
  0x59   : > { %p2467_p10 = pnand %p2465_p6, %p2779_p13 }
  0x5b   : > { %p2468_p3 = pneg %p2467_p10 }
  0x5d   : > { %p2473_p7 = pnand %p2471_p5, %p2468_p3 }
  0x5f   : > { %2476 = shalt.err (!%p2473_p7)
}
  0x60   : > { %s2477_s7 = scalar_lea.vmem %s233_s12, 2048  ;;  %p2485_p1 = scmp.lt.s32.totalorder %s233_s12, %s233_s12 }
  0x61   : > { %p2478_p9 = scmp.ne.s32.totalorder %s233_s12, %s2477_s7  ;;  %p2486_p2 = scmp.lt.s32.totalorder %s2477_s7, %s2477_s7 }
  0x63   : > { %p2480_p12 = pnand %p2478_p9, %p2779_p13  ;;  %p2487_p4 = por %p2486_p2, %p2485_p1 }
  0x65   : > { %p2481_p0 = pneg %p2480_p12 }
  0x67   : > { %p2488_p8 = pnand %p2487_p4, %p2481_p0 }
  0x69   : > { %2491 = shalt.err (!%p2488_p8)
}
  0x6a   : > { %2325 = dma.hbm_to_vmem [thread:$0]  (!%p2763_p11), %s3194_s4, 2048, %s233_s12, [#allocation9], %s3180_s30, %s3180_s30, %s3181_s9  }
  0x6b   : > { %s2669_s13 = smov [#allocation11]   ;;  %s2492_s17 = scalar_lea.hbm %s3175_s5, 2048 }
  0x6c   : > { %s245_s14 = sshll.u32 %s2669_s13, 4  ;;  %p2493_p4 = scmp.ne.s32.totalorder %s3175_s5, %s2492_s17  ;;  %s246_s14 = int_to_ptr.vmem [resolvable:$true] %s245_s14 }
  0x6d   : > { %p2499_p10 = scmp.lt.u32.totalorder %s2492_s17, %s3175_s5 }
  0x6e   : > { %p2495_p8 = pnand %p2493_p4, %p2779_p13 }
  0x70   : > { %p2496_p6 = pneg %p2495_p8 }
  0x72   : > { %p2501_p3 = pnand %p2499_p10, %p2496_p6 }
  0x74   : > { %2504 = shalt.err (!%p2501_p3)
}
  0x75   : > { %s2505_s12 = scalar_lea.vmem %s246_s14, 2048  ;;  %p2513_p12 = scmp.lt.s32.totalorder %s246_s14, %s246_s14 }
  0x76   : > { %p2506_p5 = scmp.ne.s32.totalorder %s246_s14, %s2505_s12  ;;  %p2514_p0 = scmp.lt.s32.totalorder %s2505_s12, %s2505_s12 }
  0x78   : > { %p2508_p7 = pnand %p2506_p5, %p2779_p13  ;;  %p2515_p1 = por %p2514_p0, %p2513_p12 }
  0x7a   : > { %p2509_p9 = pneg %p2508_p7 }
  0x7c   : > { %p2516_p2 = pnand %p2515_p1, %p2509_p9 }
  0x7e   : > { %2519 = shalt.err (!%p2516_p2)
}
  0x7f   : > { %2328 = dma.hbm_to_vmem [thread:$0]  (!%p2763_p11), %s3175_s5, 2048, %s246_s14, [#allocation12], %s3180_s30, %s3180_s30, %s3181_s9  }
  0x80   : > { %s2873_s18 = sadd.s32 1, %s2662_s24   ;;  %s34_s8 = sadd.s32 1, %s2658_s23 }
  0x81   : > { %s31_s13 = ssub.s32 %s2662_s24, %s2873_s18  ;;  %p41_p13 = scmp.ne.s32.totalorder %s2658_s23, %s2654_s22 }
  0x82   : > { %p32_p4 = scmp.eq.s32.totalorder %s31_s13, 0  ;;  %p42_p8 = scmp.eq.s32.totalorder %s2662_s24, 0 }
  0x83   : > { %p3195_p6 = scmp.eq.s32.totalorder %s2733_s25, 1  ;;  %p2344_p3 = scmp.lt.s32.totalorder %s2662_s24, 2 }
  0x84   : > { %s2889_s16 = scalar_select %p32_p4, %s2658_s23, %s34_s8  }
  0x85   : > { %p2883_p10 = por %p3195_p6, %p41_p13  ;;  %p43_p5 = por %p42_p8, %p41_p13 }
  0x86   : > { %s2892_s17 = sand.u32 1, %s2658_s23   ;;  %s2005_s19 = sshll.u32 %s2662_s24, 8 }
  0x87   : > { %s3196_s15 = scalar_select %p2883_p10, 1, 0 }
  0x88   : > { %s1960_s14 = sshll.u32 %s2892_s17, 4  ;;  %s3197_s0 = sld [smem:[#allocation20_spill]] }
  0x89   : > { %s263_s12 = scalar_lea.vmem [#allocation2], %s1960_s14  ;;  %p2903_p11 = pnand %p2344_p3, %p43_p5 }
  0x8a   : > { %s270_s10 = sshll.u32 %s263_s12, 4  ;;  %s1963_s13 = sshll.u32 %s2892_s17, 3  ;;  %s2901_s10 = int_to_ptr.vmem [resolvable:$true] %s270_s10 }
  0x8b   : > { %s260_s30 = scalar_lea.sflag [#allocation3], %s2892_s17  ;;  %p2522_p9 = pneg %p2903_p11 }
  0x8e   : > { %s2899_s7 = scalar_lea.hbm %s3197_s0, %s2005_s19  ;;  %s2525_s26 = scalar_lea.hbm %s3197_s0, 512 }
  0x8f   : > { %s2520_s20 = scalar_lea.hbm %s2899_s7, 256  ;;  %p2526_p1 = scmp.lt.u32.totalorder %s2899_s7, %s3197_s0 }
  0x90   : > { %p2521_p7 = scmp.ne.s32.totalorder %s2899_s7, %s2520_s20  ;;  %p2527_p2 = scmp.lt.u32.totalorder %s2525_s26, %s2520_s20 }
  0x91   : > { %p2529_p4 = scmp.lt.u32.totalorder %s2520_s20, %s2899_s7 }
  0x92   : > { %p2523_p12 = pnand %p2522_p9, %p2521_p7  ;;  %p2528_p13 = por %p2527_p2, %p2526_p1 }
  0x94   : > { %p2524_p0 = pneg %p2523_p12  ;;  %p2530_p8 = por %p2529_p4, %p2528_p13 }
  0x96   : > { %p2531_p6 = pnand %p2530_p8, %p2524_p0 }
  0x98   : > { %2534 = shalt.err (!%p2531_p6)
}
  0x99   : > { %s2535_s8 = scalar_lea.vmem %s2901_s10, 256  ;;  %s2670_s14 = smov [#allocation2]  }
  0x9a   : > { %p2536_p3 = scmp.ne.s32.totalorder %s2901_s10, %s2535_s8  ;;  %s2540_s19 = sshll.u32 %s2670_s14, 4  ;;  %s2541_s19 = int_to_ptr.vmem [resolvable:$false] %s2540_s19 }
  0x9b   : > { %s2542_s9 = scalar_lea.vmem %s2541_s19, 512  ;;  %p2543_p12 = scmp.lt.s32.totalorder %s2901_s10, %s2541_s19 }
  0x9c   : > { %p2538_p5 = pnand %p2536_p3, %p2522_p9  ;;  %p2544_p1 = scmp.lt.s32.totalorder %s2542_s9, %s2535_s8 }
  0x9e   : > { %p2539_p7 = pneg %p2538_p5  ;;  %p2545_p2 = por %p2544_p1, %p2543_p12 }
  0xa0   : > { %p2546_p13 = pnand %p2545_p2, %p2539_p7 }
  0xa2   : > { %2549 = shalt.err (!%p2546_p13)
}
  0xa3   : > { %s3199_s20 = smov 8   ;;  %s3200_s26 = smov 128  }
  0xa4   : > { %2332 = dma.hbm_to_vmem [thread:$0]  (!%p2903_p11), %s2899_s7, 256, %s2901_s10, %s260_s30, %s3200_s26, %s3200_s26, %s3199_s20  }
  0xa5   : > { %s1964_s12 = sshll.u32 %s2662_s24, 7  ;;  %s284_s9 = scalar_lea.vmem [#allocation5], %s1963_s13 }
  0xa6   : > { %s2944_s19 = scalar_lea.hbm %s3171_s1, %s1964_s12  ;;  %s291_s0 = sshll.u32 %s284_s9, 4  ;;  %s292_s0 = int_to_ptr.vmem [resolvable:$true] %s291_s0 }
  0xa7   : > { %s3201_s2 = sand.u32 1, %s2662_s24   ;;  %s2550_s4 = scalar_lea.hbm %s2944_s19, 128 }
  0xa8   : > { %s281_s3 = scalar_lea.sflag [#allocation6], %s3201_s2  ;;  %p2551_p0 = scmp.ne.s32.totalorder %s2944_s19, %s2550_s4 }
  0xa9   : > { %s2555_s10 = scalar_lea.hbm %s3171_s1, 256  ;;  %p2556_p6 = scmp.lt.u32.totalorder %s2944_s19, %s3171_s1 }
  0xaa   : > { %p2553_p4 = pnand %p2551_p0, %p2522_p9  ;;  %p2557_p3 = scmp.lt.u32.totalorder %s2555_s10, %s2550_s4 }
  0xab   : > { %p2559_p7 = scmp.lt.u32.totalorder %s2550_s4, %s2944_s19 }
  0xac   : > { %p2554_p8 = pneg %p2553_p4  ;;  %p2558_p5 = por %p2557_p3, %p2556_p6 }
  0xae   : > { %p2560_p12 = por %p2559_p7, %p2558_p5 }
  0xb0   : > { %p2561_p1 = pnand %p2560_p12, %p2554_p8 }
  0xb2   : > { %2564 = shalt.err (!%p2561_p1)
}
  0xb3   : > { %s2565_s2 = scalar_lea.vmem %s292_s0, 128  ;;  %s2671_s13 = smov [#allocation5]  }
  0xb4   : > { %p2566_p2 = scmp.ne.s32.totalorder %s292_s0, %s2565_s2  ;;  %s2570_s26 = sshll.u32 %s2671_s13, 4  ;;  %s2571_s26 = int_to_ptr.vmem [resolvable:$false] %s2570_s26 }
  0xb5   : > { %s2572_s12 = scalar_lea.vmem %s2571_s26, 256  ;;  %p2573_p4 = scmp.lt.s32.totalorder %s292_s0, %s2571_s26 }
  0xb6   : > { %p2568_p13 = pnand %p2566_p2, %p2522_p9  ;;  %p2574_p10 = scmp.lt.s32.totalorder %s2572_s12, %s2565_s2 }
  0xb8   : > { %p2569_p0 = pneg %p2568_p13  ;;  %p2575_p3 = por %p2574_p10, %p2573_p4 }
  0xba   : > { %p2576_p6 = pnand %p2575_p3, %p2569_p0 }
  0xbc   : > { %2579 = shalt.err (!%p2576_p6)
}
  0xbd   : > { %2335 = dma.hbm_to_vmem [thread:$0]  (!%p2903_p11), %s2944_s19, 128, %s292_s0, %s281_s3  }
  0xbe   : > { %p3202_p8 = scmp.ne.s32.totalorder %s3189_s29, 0 }
  0xbf   : > { %s2972_s4 = sand.u32 (!%p3202_p8), 1, %s2654_s22   ;;  %p3203_p10 = scmp.ne.s32.totalorder (!%p3202_p8), %s3187_s27, 0 }
  0xc0   : > { %300 = sbr.rel (%p3202_p8) target bundleno = 3007 (0xbbf), region = 44  ;;  %s1966_s14 = sshll.u32 (!%p3202_p8), %s2972_s4, 4 }
  0xc1   : > { %s303_s8 = scalar_lea.sflag (!%p3202_p8), [#allocation3], %s2972_s4  ;;  %s2976_s9 = scalar_lea.vmem (!%p3202_p8), [#allocation2], %s1966_s14 }
  0xc7   : > { %2625 = dma.done.wait (%p3203_p10), %s303_s8, 256  }
  0xc8   : > { %2627 = vsyncadd (%p3203_p10), %s303_s8, 4294967040  ;;  %s311_s0 = sand.u32 1, %s2733_s25   ;;  %s1967_s3 = sshll.u32 %s2972_s4, 3 }
  0xc9   : > { %s312_s29 = scalar_lea.sflag [#allocation6], %s311_s0  ;;  %s2986_s11 = scalar_lea.vmem [#allocation5], %s1967_s3 }
  0xca   : > { %2629 = dma.done.wait (%p3203_p10), %s312_s29, 128  }
  0xcb   : > { %2631 = vsyncadd (%p3203_p10), %s312_s29, 4294967168  ;;  %p3204_p11 = scmp.eq.s32.totalorder %s2733_s25, 0 }
  0xcd   : > { %2633 = dma.done.wait (%p3204_p11), [#allocation6], 512   ;;  %p3205_p9 = pmov %p3204_p11 }
  0xcf   : > { %2635 = vsyncadd (%p3205_p9), [#allocation6], 4294966784  ;;  %p3206_p5 = pmov %p3205_p9 }
  0xd1   : > { %2637 = dma.done.wait (%p3206_p5), [#allocation9], 2560   ;;  %p3207_p7 = pmov %p3206_p5 }
  0xd2   : > { %p3208_p12 = pmov %p3206_p5 }
  0xd3   : > { %2639 = vsyncadd (%p3207_p7), [#allocation9], 4294964736 }
  0xd4   : > { %2641 = dma.done.wait (%p3208_p12), [#allocation12], 2048   ;;  %p3209_p1 = pmov %p3206_p5 }
  0xd5   : > { %v2672_v0 = vmov 0.0|0.0   ;;  %vm2673_vm0 = vmmov 0   ;;  %v2674_v1 = vmov 0.0   ;;  %vm372_vm1 = vcmask 261120   ;;  %v368_v2 = vld [vmem:[#allocation7] sm:$0xff]  ;;  %v369_v3 = vld [vmem:[#allocation7 + $0x8] sm:$0xff] }
  0xd6   : > { %2643 = vsyncadd (%p3209_p1), [#allocation12], 4294965248  ;;  %2246 = vmatprep.subr.bf16.mxu0 %v2672_v0  ;;  %2125 = vmatprep.mubr.msk.f32.mxu0 %vm2673_vm0, %v2674_v1  ;;  %v370_v4 = vld [vmem:[#allocation7 + $0x10] sm:$0xff]  ;;  %v2224_v5 = vpack.c.bf16 %v369_v3, %v368_v2  ;;  %v371_v6 = vld [vmem:[#allocation7 + $0x18] sm:$0xff]  ;;  %vm708_vm2 = vcmask 1043456   ;;  %vm693_vm3 = vcmask 31744  }
  0xd7   : > { %v365_v7 = vld [vmem:[%s2976_s9] sm:$0xff]  ;;  %v2228_v8 = vpack.c.bf16 %v371_v6, %v370_v4  ;;  %v455_v10 = vld [vmem:[#allocation8 + $0x8] sm:$0xff]  ;;  %v457_v13 = vld [vmem:[#allocation8 + $0x18] sm:$0xff]  ;;  %s2675_s27 = smov 32   ;;  %s2002_s19 = sshll.u32 %s2733_s25, 7  ;;  %vm1806_vm4 = vcmask 523264  }
  0xd8   : > { %2082 = vmatprep.mubr.msk.f32.mxu1 %vm372_vm1, %v365_v7  ;;  %v454_v9 = vld [vmem:[#allocation8] sm:$0xff]  ;;  %2225 = vmatprep.subr.bf16.mxu1 %v2224_v5  ;;  %v456_v12 = vld [vmem:[#allocation8 + $0x10] sm:$0xff]  ;;  %v366_v14 = vld [vmem:[%s2976_s9 + $0x8] sm:$0xff]  ;;  %s364_s30 = scalar_lea.vmem [#allocation13], %s1967_s3  ;;  %s3125_s20 = scalar_lea.hbm %s3176_s6, %s2002_s19 }
  0xd9   : > { %2227 = vmatpush3.bf16.msra.mxu1 %v2224_v5  ;;  %v2232_v11 = vpack.c.bf16 %v455_v10, %v454_v9  ;;  %v2236_v15 = vpack.c.bf16 %v457_v13, %v456_v12  ;;  %v541_v16 = vld [vmem:[#allocation10] sm:$0xff]  ;;  %v542_v17 = vld [vmem:[#allocation10 + $0x8] sm:$0xff]  ;;  %v543_v19 = vld [vmem:[#allocation10 + $0x10] sm:$0xff]  ;;  %s1822_s7 = sshll.u32 %s364_s30, 4  ;;  %s1809_s25 = scalar_lea.sflag [#allocation4], %s2972_s4  ;;  %s3127_s7 = int_to_ptr.vmem [resolvable:$true] %s1822_s7 }
  0xda   : > { %2229 = vmatprep.subr.bf16.mxu1 %v2228_v8  ;;  %v2241_v18 = vpack.c.bf16 %v542_v17, %v541_v16  ;;  %v544_v20 = vld [vmem:[#allocation10 + $0x18] sm:$0xff]  ;;  %v782_v29 = vld [vmem:[#allocation10 + $0x20] sm:$0xff]  ;;  %v783_v30 = vld [vmem:[#allocation10 + $0x28] sm:$0xff]  ;;  %s2580_s2 = scalar_lea.vmem %s3127_s7, 128  ;;  %p3210_p13 = scmp.ne.s32.totalorder %s3196_s15, 0 }
  0xdb   : > { %v2244_v21 = vpack.c.bf16 %v544_v20, %v543_v19  ;;  %v3018_v22 = vld [vmem:[%s2986_s11] sm:$0xff]  ;;  %v2247_v32 = vpack.c.bf16 %v783_v30, %v782_v29  ;;  %v1018_v50 = vld [vmem:[#allocation10 + $0x40] sm:$0xff]  ;;  %v1019_v51 = vld [vmem:[#allocation10 + $0x48] sm:$0xff]  ;;  %p2581_p2 = scmp.ne.s32.totalorder %s3127_s7, %s2580_s2  ;;  %s2676_s13 = smov [#allocation13]  }
  0xdc   : > { %v784_v31 = vld [vmem:[#allocation10 + $0x30] sm:$0xff]  ;;  %v785_v33 = vld [vmem:[#allocation10 + $0x38] sm:$0xff]  ;;  %v2253_v53 = vpack.c.bf16 %v1019_v51, %v1018_v50  ;;  %v1254_v6 = vld [vmem:[#allocation10 + $0x60] sm:$0xff]  ;;  %s2584_s26 = sshll.u32 %s2676_s13, 4  ;;  %s2585_s26 = int_to_ptr.vmem [resolvable:$false] %s2584_s26 }
  0xdd   : > { %2231 = vmatpush3.bf16.msra.mxu1 %v2228_v8  ;;  %2248 = vmatpush3.bf16.msra.mxu0 %v2247_v32  ;;  %v2250_v34 = vpack.c.bf16 %v785_v33, %v784_v31  ;;  %v1020_v52 = vld [vmem:[#allocation10 + $0x50] sm:$0xff]  ;;  %v1021_v54 = vld [vmem:[#allocation10 + $0x58] sm:$0xff]  ;;  %v1494_v12 = vld [vmem:[#allocation11 + $0x20] sm:$0xff]  ;;  %p2582_p0 = pnand %p2581_p2, %p3210_p13  ;;  %s2586_s12 = scalar_lea.vmem %s2585_s26, 256 }
  0xde   : > { %2233 = vmatprep.subr.bf16.mxu1 %v2232_v11  ;;  %2249 = vmatprep.subr.bf16.mxu0 %v2672_v0  ;;  %v2256_v55 = vpack.c.bf16 %v1021_v54, %v1020_v52  ;;  %v1256_v8 = vld [vmem:[#allocation10 + $0x70] sm:$0xff]  ;;  %v1257_v10 = vld [vmem:[#allocation10 + $0x78] sm:$0xff]  ;;  %v1495_v13 = vld [vmem:[#allocation11 + $0x28] sm:$0xff]  ;;  %p2587_p3 = scmp.lt.s32.totalorder %s3127_s7, %s2585_s26  ;;  %p2588_p6 = scmp.lt.s32.totalorder %s2586_s12, %s2580_s2 }
  0xdf   : > { %v1497_v16 = vld [vmem:[#allocation11 + $0x38] sm:$0xff]  ;;  %p2583_p4 = pneg %p2582_p0 }
  0xe0   : > { %2083 = vmatmul.mubr.msk.f32.vlgmr.msra.gmra.mrb[0].mxu1 %vm372_vm1, %v366_v14  ;;  %p2589_p8 = por %p2588_p6, %p2587_p3 }
  0xe1   : > { %2235 = vmatpush3.bf16.msra.mxu1 %v2232_v11  ;;  %2093 = vmatprep.mubr.msk.f32.mxu1 %vm372_vm1, %v365_v7  ;;  %v1255_v7 = vld [vmem:[#allocation10 + $0x68] sm:$0xff]  ;;  %v2262_v11 = vpack.c.bf16 %v1257_v10, %v1256_v8 }
  0xe2   : > { %2237 = vmatprep.subr.bf16.mxu1 %v2236_v15  ;;  %2251 = vmatpush3.bf16.msra.mxu0 %v2250_v34  ;;  %v2259_v9 = vpack.c.bf16 %v1255_v7, %v1254_v6  ;;  %p2590_p10 = pnand %p2589_p8, %p2583_p4 }
  0xe3   : > { %2252 = vmatprep.subr.bf16.mxu0 %v2672_v0 }
  0xe5   : > { %2239 = vmatpush3.bf16.msra.mxu1 %v2236_v15  ;;  %2126 = vmatmul.mubr.msk.f32.vlgmr.msra.gmra.mrb[0].mxu0 %vm372_vm1, %v3018_v22  ;;  %v1496_v15 = vld [vmem:[#allocation11 + $0x30] sm:$0xff] }
  0xe6   : > { %2240 = vmatprep.subr.bf16.mxu1 %v2672_v0  ;;  %2146 = vmatprep.mubr.msk.f32.mxu0 %vm2673_vm0, %v2674_v1  ;;  %v2268_v17 = vpack.c.bf16 %v1497_v16, %v1496_v15 }
  0xe7   : > { %2254 = vmatpush3.bf16.msra.mxu0 %v2253_v53 }
  0xe8   : > { %2094 = vmatmul.mubr.msk.f32.vlgmr.msra.gmra.mrb[2].mxu1 %vm372_vm1, %v366_v14  ;;  %2255 = vmatprep.subr.bf16.mxu0 %v2672_v0  ;;  %v2265_v14 = vpack.c.bf16 %v1495_v13, %v1494_v12 }
  0xe9   : > { %2242 = vmatpush3.bf16.msra.mxu1 %v2241_v18  ;;  %2104 = vmatprep.mubr.msk.f32.mxu1 %vm2673_vm0, %v2674_v1 }
  0xea   : > { %2243 = vmatprep.subr.bf16.mxu1 %v2672_v0 }
  0xeb   : > { %2257 = vmatpush3.bf16.msra.mxu0 %v2256_v55 }
  0xec   : > { %2258 = vmatprep.subr.bf16.mxu0 %v2672_v0 }
  0xed   : > { %2245 = vmatpush3.bf16.msra.mxu1 %v2244_v21  ;;  %v1489_v21 = vld [vmem:[#allocation11] sm:$0xff] }
  0xee   : > { %2107 = vmatprep.subr.mxu1 %v2674_v1  ;;  %2147 = vmatmul.mubr.msk.f32.vlgmr.msra.gmra.mrb[2].mxu0 %vm372_vm1, %v3018_v22 }
  0xef   : > { %2167 = vmatprep.mubr.msk.f32.mxu0 %vm2673_vm0, %v2674_v1  ;;  %2260 = vmatpush3.bf16.msra.mxu0 %v2259_v9 }
  0xf0   : > { %2105 = vmatmul.mubr.msk.f32.vlgmr.msra.gmra.mrb[4].mxu1 %vm372_vm1, %v3018_v22  ;;  %2261 = vmatprep.subr.bf16.mxu0 %v2672_v0 }
  0xf1   : > { %2109 = vmatprep.mubr.msk.f32.mxu1 %vm2673_vm0, %v2674_v1 }
  0xf3   : > { %2263 = vmatpush3.bf16.msra.mxu0 %v2262_v11 }
  0xf4   : > { %2264 = vmatprep.subr.bf16.mxu0 %v2672_v0 }
  0xf6   : > { %2168 = vmatmul.mubr.msk.f32.vlgmr.msra.gmra.mrb[4].mxu0 %vm372_vm1, %v3018_v22 }
  0xf7   : > { %2266 = vmatpush3.bf16.msra.mxu0 %v2265_v14  ;;  %2188 = vmatprep.mubr.msk.f32.mxu0 %vm2673_vm0, %v2674_v1 }
  0xf8   : > { %2267 = vmatprep.subr.bf16.mxu0 %v2672_v0 }
  0xfb   : > { %2269 = vmatpush3.bf16.msra.mxu0 %v2268_v17 }
  0xfc   : > { %2270 = vmatprep.subr.bf16.mxu0 %v2672_v0 }
 0x1b3   : > { %v3025_v23 = vpop.f32.mrb[0].mxu1 }
 0x1b4   : > { %v445_v24 = vpop.f32.mrb[1].mxu1  ;;  %v536_v51 = vcombine.high %v3025_v23, %v3025_v23 }
 0x1b5   : > { %2108 = vmatpush3.xpose.msk.msra.mxu1 %vm372_vm1, %v445_v24  ;;  %v535_v48 = vcombine.high %v445_v24, %v445_v24  ;;  %v1490_v24 = vld [vmem:[#allocation11 + $0x8] sm:$0xff] }
 0x1b6   : > { %2112 = vmatprep.subr.mxu1 %v2674_v1 }
 0x1b8   : > { %v852_v43 = vpop.f32.mrb[0].mxu0 }
 0x1b9   : > { %v2127_v44 = vpop.f32.mrb[1].mxu0 }
 0x1ba   : > { %v1647_v44 = vld [vmem:[#allocation11 + $0x50] sm:$0xff] }
 0x1bb   : > { %v3029_v25 = vpop.f32.mrb[2].mxu1 }
 0x1bc   : > { %v524_v26 = vpop.f32.mrb[3].mxu1  ;;  %v540_v52 = vcombine.high %v3029_v25, %v3029_v25 }
 0x1bd   : > { %v539_v49 = vcombine.high %v524_v26, %v524_v26 }
 0x1c1   : > { %v1088_v4 = vpop.f32.mrb[2].mxu0 }
 0x1c2   : > { %v2148_v5 = vpop.f32.mrb[3].mxu0 }
 0x1c3   : > { %v614_v27 = vpop.f32.mrb[4].mxu1 }
 0x1c4   : > { %v2106_v28 = vpop.f32.mrb[5].mxu1  ;;  %2110 = vmatmul.mubr.msk.f32.vlgmr.msra.gmra.mrb[6].mxu1 %vm372_vm1, %v614_v27  ;;  %v1491_v27 = vld [vmem:[#allocation11 + $0x10] sm:$0xff] }
 0x1c5   : > { %2113 = vmatpush3.msk.msra.mxu1 %vm708_vm2, %v524_v26  ;;  %2114 = vmatprep.mubr.msk.f32.mxu1 %vm2673_vm0, %v2674_v1  ;;  %v2271_v26 = vpack.c.bf16 %v1490_v24, %v1489_v21  ;;  %v1492_v28 = vld [vmem:[#allocation11 + $0x18] sm:$0xff] }
 0x1c6   : > { %2128 = vmatprep.subr.mxu1 %v2674_v1  ;;  %v2274_v31 = vpack.c.bf16 %v1492_v28, %v1491_v27 }
 0x297   : > { %v689_v35 = vpop.f32.mrb[6].mxu1 }
 0x298   : > { %v2111_v36 = vpop.f32.mrb[7].mxu1  ;;  %v694_v37 = vsel %vm693_vm3, %v689_v35, -inf }
 0x299   : > { %695 = vmax.xlane.f32.xlu0 %v694_v37 }
 0x326   : > { %v696_v38 = vpop.xlane.xlu0 %695 }
 0x327   : > { %v697_v39 = vsub.f32 %v689_v35, %v696_v38 }
 0x329   : > { %v698_v40 = vmul.f32 1.442695, %v697_v39 }
 0x32b   : > { %2392 = vpow2.f32 %v698_v40  ;;  %v1324_v40 = vpop.f32.mrb[4].mxu0 }
 0x335   : > { %v2393_v41 = vpop.eup %2392 }
 0x336   : > { %v700_v42 = vsel %vm693_vm3, %v2393_v41, 0.0 }
 0x337   : > { %701 = vadd.xlane.f32.xlu0 %v700_v42  ;;  %v1645_v42 = vld [vmem:[#allocation11 + $0x40] sm:$0xff] }
 0x3c4   : > { %v702_v45 = vpop.xlane.xlu0 %701 }
 0x3c5   : > { %2394 = vrcp.f32 %v702_v45 }
 0x3cf   : > { %v2395_v46 = vpop.eup %2394 }
 0x3d0   : > { %v704_v47 = vmul.f32 %v2395_v46, %v2393_v41  ;;  %v2169_v41 = vpop.f32.mrb[5].mxu0  ;;  %v1648_v46 = vld [vmem:[#allocation11 + $0x58] sm:$0xff] }
 0x3d2   : > { %2115 = vmatmul.mubr.msk.f32.vlgmr.msra.gmra.mrb[8].mxu1 %vm693_vm3, %v704_v47  ;;  %v2280_v47 = vpack.c.bf16 %v1648_v46, %v1647_v44 }
 0x3d3   : > { %2129 = vmatpush3.xpose.msk.msra.mxu1 %vm372_vm1, %v535_v48  ;;  %2130 = vmatprep.mubr.msk.f32.mxu1 %vm2673_vm0, %v2674_v1 }
 0x3d4   : > { %2133 = vmatprep.subr.mxu1 %v2674_v1 }
 0x3d6   : > { %2131 = vmatmul.mubr.msk.f32.vlgmr.msra.gmra.mrb[10].mxu1 %vm372_vm1, %v852_v43  ;;  %v1646_v43 = vld [vmem:[#allocation11 + $0x48] sm:$0xff] }
 0x3d7   : > { %2134 = vmatpush3.msk.msra.mxu1 %vm708_vm2, %v539_v49  ;;  %2135 = vmatprep.mubr.msk.f32.mxu1 %vm2673_vm0, %v2674_v1  ;;  %v2277_v45 = vpack.c.bf16 %v1646_v43, %v1645_v42 }
 0x3d8   : > { %2149 = vmatprep.subr.mxu1 %v2674_v1 }
 0x4a5   : > { %v3060_v56 = vpop.f32.mrb[8].mxu1 }
 0x4a6   : > { %v2116_v57 = vpop.f32.mrb[9].mxu1 }
 0x4a9   : > { %v927_v58 = vpop.f32.mrb[10].mxu1 }
 0x4aa   : > { %v2132_v59 = vpop.f32.mrb[11].mxu1  ;;  %v931_v60 = vsel %vm693_vm3, %v927_v58, -inf }
 0x4ab   : > { %932 = vmax.xlane.f32.xlu1 %v931_v60 }
 0x538   : > { %v933_v61 = vpop.xlane.xlu1 %932 }
 0x539   : > { %v934_v62 = vsub.f32 %v927_v58, %v933_v61  ;;  %v1724_v61 = vld [vmem:[#allocation11 + $0x60] sm:$0xff] }
 0x53b   : > { %v935_v63 = vmul.f32 1.442695, %v934_v62  ;;  %v1725_v62 = vld [vmem:[#allocation11 + $0x68] sm:$0xff] }
 0x53d   : > { %2396 = vpow2.f32 %v935_v63  ;;  %v1726_v63 = vld [vmem:[#allocation11 + $0x70] sm:$0xff] }
 0x547   : > { %v2397_v2 = vpop.eup %2396 }
 0x548   : > { %v937_v3 = vsel %vm693_vm3, %v2397_v2, 0.0 }
 0x549   : > { %938 = vadd.xlane.f32.xlu1 %v937_v3  ;;  %v1727_v3 = vld [vmem:[#allocation11 + $0x78] sm:$0xff] }
 0x5d6   : > { %v939_v18 = vpop.xlane.xlu1 %938 }
 0x5d7   : > { %2398 = vrcp.f32 %v939_v18 }
 0x5e1   : > { %v2399_v19 = vpop.eup %2398 }
 0x5e2   : > { %v941_v20 = vmul.f32 %v2399_v19, %v2397_v2  ;;  %v2283_v2 = vpack.c.bf16 %v1725_v62, %v1724_v61 }
 0x5e4   : > { %2136 = vmatmul.mubr.msk.f32.vlgmr.msra.gmra.mrb[12].mxu1 %vm693_vm3, %v941_v20 }
 0x5e5   : > { %2150 = vmatpush3.xpose.msk.msra.mxu1 %vm372_vm1, %v3025_v23  ;;  %2151 = vmatprep.mubr.msk.f32.mxu1 %vm2673_vm0, %v2674_v1 }
 0x5e6   : > { %2154 = vmatprep.subr.mxu1 %v2674_v1 }
 0x5e8   : > { %2152 = vmatmul.mubr.msk.f32.vlgmr.msra.gmra.mrb[14].mxu1 %vm372_vm1, %v1088_v4 }
 0x5e9   : > { %2155 = vmatpush3.msk.msra.mxu1 %vm708_vm2, %v3029_v25  ;;  %2156 = vmatprep.mubr.msk.f32.mxu1 %vm2673_vm0, %v2674_v1 }
 0x5ea   : > { %2170 = vmatprep.subr.mxu1 %v2674_v1 }
 0x6b7   : > { %v1013_v29 = vpop.f32.mrb[12].mxu1 }
 0x6b8   : > { %v2137_v30 = vpop.f32.mrb[13].mxu1  ;;  %2189 = vmatmul.mubr.msk.f32.vlgmr.msra.gmra.mrb[6].mxu0 %vm372_vm1, %v1013_v29 }
 0x6b9   : > { %2272 = vmatpush3.bf16.msra.mxu0 %v2271_v26  ;;  %2199 = vmatprep.mubr.msk.f32.mxu0 %vm2673_vm0, %v2674_v1 }
 0x6ba   : > { %2273 = vmatprep.subr.bf16.mxu0 %v2672_v0 }
 0x6bb   : > { %v1163_v32 = vpop.f32.mrb[14].mxu1 }
 0x6bc   : > { %v2153_v33 = vpop.f32.mrb[15].mxu1  ;;  %v1167_v34 = vsel %vm693_vm3, %v1163_v32, -inf }
 0x6bd   : > { %2275 = vmatpush3.bf16.msra.mxu0 %v2274_v31  ;;  %1168 = vmax.xlane.f32.xlu0 %v1167_v34 }
 0x6be   : > { %2276 = vmatprep.subr.bf16.mxu0 %v2672_v0 }
 0x6c0   : > { %2200 = vmatmul.mubr.msk.f32.vlgmr.msra.gmra.mrb[6].mxu0 %vm372_vm1, %v3060_v56 }
 0x6c1   : > { %2210 = vmatprep.mubr.msk.f32.mxu0 %vm2673_vm0, %v2674_v1  ;;  %2278 = vmatpush3.bf16.msra.mxu0 %v2277_v45 }
 0x6c2   : > { %2279 = vmatprep.subr.bf16.mxu0 %v2672_v0 }
 0x6c5   : > { %2281 = vmatpush3.bf16.msra.mxu0 %v2280_v47 }
 0x6c6   : > { %2282 = vmatprep.subr.bf16.mxu0 %v2672_v0 }
 0x74a   : > { %v1169_v35 = vpop.xlane.xlu0 %1168 }
 0x74b   : > { %v1170_v36 = vsub.f32 %v1163_v32, %v1169_v35 }
 0x74d   : > { %v1171_v37 = vmul.f32 1.442695, %v1170_v36 }
 0x74f   : > { %2400 = vpow2.f32 %v1171_v37 }
 0x759   : > { %v2401_v38 = vpop.eup %2400 }
 0x75a   : > { %v1173_v39 = vsel %vm693_vm3, %v2401_v38, 0.0 }
 0x75b   : > { %1174 = vadd.xlane.f32.xlu1 %v1173_v39 }
 0x7e8   : > { %v1175_v48 = vpop.xlane.xlu1 %1174 }
 0x7e9   : > { %2402 = vrcp.f32 %v1175_v48 }
 0x7f3   : > { %v2403_v49 = vpop.eup %2402 }
 0x7f4   : > { %v1177_v50 = vmul.f32 %v2403_v49, %v2401_v38 }
 0x7f6   : > { %2157 = vmatmul.mubr.msk.f32.vlgmr.msra.gmra.mrb[16].mxu1 %vm693_vm3, %v1177_v50 }
 0x7f7   : > { %2171 = vmatpush3.xpose.msk.msra.mxu1 %vm372_vm1, %v536_v51  ;;  %2172 = vmatprep.mubr.msk.f32.mxu1 %vm2673_vm0, %v2674_v1 }
 0x7f8   : > { %2175 = vmatprep.subr.mxu1 %v2674_v1 }
 0x7fa   : > { %2173 = vmatmul.mubr.msk.f32.vlgmr.msra.gmra.mrb[18].mxu1 %vm372_vm1, %v1324_v40 }
 0x7fb   : > { %2176 = vmatpush3.msk.msra.mxu1 %vm708_vm2, %v540_v52  ;;  %2177 = vmatprep.mubr.msk.f32.mxu1 %vm2673_vm0, %v2674_v1 }
 0x8c9   : > { %v1249_v23 = vpop.f32.mrb[16].mxu1 }
 0x8ca   : > { %v2158_v53 = vpop.f32.mrb[17].mxu1  ;;  %2211 = vmatmul.mubr.msk.f32.vlgmr.msra.gmra.mrb[6].mxu0 %vm372_vm1, %v1249_v23 }
 0x8cb   : > { %2221 = vmatprep.mubr.msk.f32.mxu0 %vm2673_vm0, %v2674_v1  ;;  %2284 = vmatpush3.bf16.msra.mxu0 %v2283_v2  ;;  %v2286_v1 = vpack.c.bf16 %v1727_v3, %v1726_v63 }
 0x8cc   : > { %2285 = vmatprep.subr.bf16.mxu0 %v2672_v0 }
 0x8cd   : > { %v1399_v54 = vpop.f32.mrb[18].mxu1 }
 0x8ce   : > { %v2174_v55 = vpop.f32.mrb[19].mxu1  ;;  %v1403_v56 = vsel %vm693_vm3, %v1399_v54, -inf }
 0x8cf   : > { %1404 = vmax.xlane.f32.xlu0 %v1403_v56  ;;  %2287 = vmatpush3.bf16.msra.mxu0 %v2286_v1 }
 0x8e5   : > { %1802 = vrot.lane.b32.xlu0 %v3018_v22, %s2675_s27 }
 0x95c   : > { %v1405_v25 = vpop.xlane.xlu0 %1404 }
 0x95d   : > { %v1406_v57 = vsub.f32 %v1399_v54, %v1405_v25 }
 0x95f   : > { %v1407_v58 = vmul.f32 1.442695, %v1406_v57 }
 0x960   : > { %v1803_v0 = vpop.permute.xlu0 %1802 }
 0x961   : > { %2404 = vpow2.f32 %v1407_v58 }
 0x96b   : > { %v2405_v59 = vpop.eup %2404 }
 0x96c   : > { %v1409_v60 = vsel %vm693_vm3, %v2405_v59, 0.0 }
 0x96d   : > { %1410 = vadd.xlane.f32.xlu1 %v1409_v60 }
 0x9fa   : > { %v1411_v4 = vpop.xlane.xlu1 %1410 }
 0x9fb   : > { %2406 = vrcp.f32 %v1411_v4 }
 0xa05   : > { %v2407_v5 = vpop.eup %2406 }
 0xa06   : > { %v1413_v6 = vmul.f32 %v2407_v5, %v2405_v59 }
 0xa08   : > { %2178 = vmatmul.mubr.msk.f32.vlgmr.msra.gmra.mrb[20].mxu1 %vm693_vm3, %v1413_v6 }
 0xadb   : > { %v1485_v7 = vpop.f32.mrb[20].mxu1 }
 0xadc   : > { %v2179_v8 = vpop.f32.mrb[21].mxu1  ;;  %2222 = vmatmul.mubr.msk.f32.vlgmr.msra.gmra.mrb[6].mxu0 %vm372_vm1, %v1485_v7 }
 0xbaf   : > { %v1797_v9 = vpop.f32.mrb[6].mxu0 }
 0xbb0   : > { %v1805_v22 = vsel %vm372_vm1, %v1797_v9, %v1803_v0  ;;  %v2223_v10 = vpop.f32.mrb[7].mxu0 }
 0xbb1   : > { %1807 = vst.msk [vmem:[%s364_s30] sm:$0xff] %vm1806_vm4, %v1805_v22 }
 0xbb2   : > { %2593 = shalt.err (!%p2590_p10)
}
 0xbb3   : > { %s2594_s4 = scalar_lea.hbm %s3125_s20, 128  ;;  %s2598_s9 = scalar_lea.hbm %s3176_s6, 256 }
 0xbb4   : > { %p2595_p11 = scmp.ne.s32.totalorder %s3125_s20, %s2594_s4  ;;  %p2599_p7 = scmp.lt.u32.totalorder %s3125_s20, %s3176_s6 }
 0xbb5   : > { %p2600_p12 = scmp.lt.u32.totalorder %s2598_s9, %s2594_s4  ;;  %p2602_p2 = scmp.lt.u32.totalorder %s2594_s4, %s3125_s20 }
 0xbb6   : > { %p2596_p9 = pnand %p2595_p11, %p3210_p13 }
 0xbb7   : > { %p2601_p1 = por %p2600_p12, %p2599_p7 }
 0xbb8   : > { %p2597_p5 = pneg %p2596_p9 }
 0xbb9   : > { %p2603_p0 = por %p2602_p2, %p2601_p1 }
 0xbbb   : > { %p2604_p4 = pnand %p2603_p0, %p2597_p5 }
 0xbbd   : > { %2607 = shalt.err (!%p2604_p4)
}
 0xbbe   : > { %2314 = dma.vmem_to_hbm [thread:$0]  (%p3210_p13), %s3127_s7, 128, %s3125_s20, %s1809_s25  }
 0xbbf PF: > { %s1834_s29 = sand.u32 1, %s2650_s21   ;;  %p3211_p3 = scmp.ne.s32.totalorder %s3188_s28, 0 }
 0xbc0   : > { %p3212_p6 = scmp.ge.s32.totalorder %s2662_s24, 2  ;;  %s1835_s11 = scalar_lea.sflag [#allocation4], %s1834_s29 }
 0xbc2   : > { %p2337_p8 = pnand %p3212_p6, %p3211_p3 }
 0xbc4   : > { %2645 = dma.done.wait (!%p2337_p8), %s1835_s11, 128  }
 0xbc5   : > { %2647 = vsyncadd (!%p2337_p8), %s1835_s11, 4294967168  ;;  %p24_p10 = scmp.ge.s32.totalorder %s2873_s18, 4   ;;  %s3213_s21 = smov %s2654_s22 }
 0xbc6   : > { %s3214_s22 = smov %s2658_s23  ;;  %s3215_s23 = smov %s2889_s16 }
 0xbc7   : > { %s3216_s24 = smov %s2873_s18  ;;  %26 = sbr.rel (!%p24_p10) target bundleno = 14 (0xe), region = 124 }
 0xbce   :  { %1840 = vsyncpa [#allocation3], 1 }
 0xbcf   :  { %1842 = vsyncpa [#allocation3 + $0x1], 1 }
 0xbd0   :  { %1843 = vsyncpa [#allocation6], 1 }
 0xbd1   :  { %1845 = vsyncpa [#allocation6 + $0x1], 1 }
 0xbd2   :  { %1846 = vsyncpa [#allocation9], 1 }
 0xbd3   :  { %1847 = vsyncpa [#allocation12], 1 }
 0xbd4   :  { %1848 = vsyncpa [#allocation4], 1 }
 0xbd5   :  { %1850 = vsyncpa [#allocation4 + $0x1], 1 }

// kernel: tpu_custom_call.1
= control target key start
LH: loop header
LB: loop body
LE: loop exit
PB: predicated region body
PF: predicated region fallthrough
CT: control target
= control target key end

     0   :  { %s3170_s0 = inlined_call_operand.hbm [shape: f32[2,16,32], index: 0, kind: input, shape index: {}]   ;;  %s3171_s1 = inlined_call_operand.hbm [shape: f32[2,8,32], index: 1, kind: input, shape index: {}]   ;;  %s3172_s2 = inlined_call_operand.hbm [shape: f32[32,32], index: 2, kind: input, shape index: {}]   ;;  %s3173_s3 = inlined_call_operand.hbm [shape: f32[32,32], index: 3, kind: input, shape index: {}]   ;;  %s3174_s4 = inlined_call_operand.hbm [shape: f32[4,32,32], index: 4, kind: input, shape index: {}]   ;;  %s3175_s5 = inlined_call_operand.hbm [shape: f32[4,32,32], index: 5, kind: input, shape index: {}]   ;;  %s3176_s6 = inlined_call_operand.hbm [shape: f32[2,8,64], index: 6, kind: output, shape index: {}]  }
   0x1   :  { %3183 = sst [smem:[#allocation20_spill]] %s3170_s0 }
   0x2   :  { %3184 = sst [smem:[#allocation21_spill]] %s3172_s2 }
   0x3   :  { %3185 = sst [smem:[#allocation22_spill]] %s3173_s3 }
   0x4   :  { %3186 = sst [smem:[#allocation23_spill]] %s3174_s4 }
   0x5   :  { %11 = vsyncpa [#allocation3], 0 }
   0x6   :  { %13 = vsyncpa [#allocation3 + $0x1], 0 }
   0x7   :  { %14 = vsyncpa [#allocation6], 0 }
   0x8   :  { %16 = vsyncpa [#allocation6 + $0x1], 0 }
   0x9   :  { %17 = vsyncpa [#allocation9], 0 }
   0xa   :  { %18 = vsyncpa [#allocation12], 0 }
   0xb   :  { %19 = vsyncpa [#allocation4], 0 }
   0xc   :  { %21 = vsyncpa [#allocation4 + $0x1], 0  ;;  %s2712_s21 = smov 0   ;;  %s2714_s22 = smov 0  }
   0xd   :  { %s2716_s23 = smov 0   ;;  %s2718_s24 = smov 0  }
   0xe LB: > { %s2733_s25 = sadd.s32 4294967295, %s2662_s24   ;;  %s1953_s26 = sadd.s32 4294967294, %s2662_s24   ;;  %s2662_s24 = sphi %s2718_s24, %s3216_s24   ;;  %s2658_s23 = sphi %s2716_s23, %s3215_s23   ;;  %s2654_s22 = sphi %s2714_s22, %s3214_s22   ;;  %s2650_s21 = sphi %s2712_s21, %s3213_s21  }
   0xf   : > { %p47_p0 = scmp.ne.s32.totalorder %s2654_s22, %s2650_s21  ;;  %p3177_p1 = scmp.eq.s32.totalorder %s2733_s25, 0 }
  0x10   : > { %p187_p3 = scmp.eq.s32.totalorder %s1953_s26, 1  ;;  %p1954_p5 = scmp.ge.s32.totalorder %s2662_s24, 1 }
  0x11   : > { %p2742_p4 = por %p3177_p1, %p47_p0  ;;  %p194_p7 = scmp.lt.s32.totalorder %s2662_s24, 3 }
  0x12   : > { %p2747_p6 = por %p187_p3, %p47_p0  ;;  %s2664_s30 = smov [#allocation7]  }
  0x13   : > { %s3187_s27 = scalar_select %p2742_p4, 1, 0 }
  0x14   : > { %s3188_s28 = scalar_select %p2747_p6, 1, 0 }
  0x15   : > { %p2752_p8 = pnand %p1954_p5, %p194_p7  ;;  %s206_s7 = sshll.u32 %s2664_s30, 4  ;;  %s2756_s7 = int_to_ptr.vmem [resolvable:$true] %s206_s7 }
  0x16   : > { %s2665_s9 = smov [#allocation8]   ;;  %s2666_s11 = smov [#allocation10]  }
  0x17   : > { %s3189_s29 = scalar_select %p2752_p8, 1, 0 }
  0x18   : > { %p2316_p9 = pneg %p2752_p8  ;;  %s219_s10 = sshll.u32 %s2665_s9, 4  ;;  %s2767_s10 = int_to_ptr.vmem [resolvable:$true] %s219_s10 }
  0x19   : > { %s2769_s12 = sshll.u32 %s2666_s11, 4  ;;  %s3191_s2 = sld [smem:[#allocation21_spill]]  ;;  %s233_s12 = int_to_ptr.vmem [resolvable:$true] %s2769_s12 }
  0x1a   : > { %p2763_p11 = pnand %p2316_p9, %p3177_p1 }
  0x1c   : > { %p2779_p13 = pneg %p2763_p11 }
  0x1f   : > { %s2408_s15 = scalar_lea.hbm %s3191_s2, 512 }
  0x20   : > { %p2409_p12 = scmp.ne.s32.totalorder %s3191_s2, %s2408_s15  ;;  %p2415_p5 = scmp.lt.u32.totalorder %s2408_s15, %s3191_s2 }
  0x22   : > { %p2411_p0 = pnand %p2779_p13, %p2409_p12 }
  0x24   : > { %p2412_p3 = pneg %p2411_p0 }
  0x26   : > { %p2417_p7 = pnand %p2415_p5, %p2412_p3 }
  0x28   : > { %2420 = shalt.err (!%p2417_p7)
}
  0x29   : > { %s2421_s26 = scalar_lea.vmem %s2756_s7, 512  ;;  %p2429_p2 = scmp.lt.s32.totalorder %s2756_s7, %s2756_s7 }
  0x2a   : > { %p2422_p9 = scmp.ne.s32.totalorder %s2756_s7, %s2421_s26  ;;  %p2430_p6 = scmp.lt.s32.totalorder %s2421_s26, %s2421_s26 }
  0x2c   : > { %p2424_p10 = pnand %p2422_p9, %p2779_p13  ;;  %p2431_p12 = por %p2430_p6, %p2429_p2 }
  0x2e   : > { %p2425_p1 = pneg %p2424_p10 }
  0x30   : > { %p2432_p0 = pnand %p2431_p12, %p2425_p1 }
  0x32   : > { %2435 = shalt.err (!%p2432_p0)
}
  0x33   : > { %s3180_s30 = smov 128   ;;  %s3181_s9 = smov 8  }
  0x34   : > { %2319 = dma.hbm_to_vmem [thread:$0]  (!%p2763_p11), %s3191_s2, 512, %s2756_s7, [#allocation6], %s3180_s30, %s3180_s30, %s3181_s9  }
  0x35   : > { %s3193_s3 = sld [smem:[#allocation22_spill]] }
  0x3b   : > { %s2436_s16 = scalar_lea.hbm %s3193_s3, 512 }
  0x3c   : > { %p2437_p1 = scmp.ne.s32.totalorder %s3193_s3, %s2436_s16  ;;  %p2443_p10 = scmp.lt.u32.totalorder %s2436_s16, %s3193_s3 }
  0x3e   : > { %p2439_p2 = pnand %p2437_p1, %p2779_p13 }
  0x40   : > { %p2440_p6 = pneg %p2439_p2 }
  0x42   : > { %p2445_p3 = pnand %p2443_p10, %p2440_p6 }
  0x44   : > { %2448 = shalt.err (!%p2445_p3)
}
  0x45   : > { %s2449_s7 = scalar_lea.vmem %s2767_s10, 512  ;;  %p2457_p12 = scmp.lt.s32.totalorder %s2767_s10, %s2767_s10 }
  0x46   : > { %p2450_p5 = scmp.ne.s32.totalorder %s2767_s10, %s2449_s7  ;;  %p2458_p0 = scmp.lt.s32.totalorder %s2449_s7, %s2449_s7 }
  0x48   : > { %p2452_p7 = pnand %p2450_p5, %p2779_p13  ;;  %p2459_p1 = por %p2458_p0, %p2457_p12 }
  0x4a   : > { %p2453_p9 = pneg %p2452_p7 }
  0x4c   : > { %p2460_p2 = pnand %p2459_p1, %p2453_p9 }
  0x4e   : > { %2463 = shalt.err (!%p2460_p2)
}
  0x4f   : > { %2322 = dma.hbm_to_vmem [thread:$0]  (!%p2763_p11), %s3193_s3, 512, %s2767_s10, [#allocation9], %s3180_s30, %s3180_s30, %s3181_s9  }
  0x50   : > { %s3194_s4 = sld [smem:[#allocation23_spill]] }
  0x56   : > { %s2464_s16 = scalar_lea.hbm %s3194_s4, 2048 }
  0x57   : > { %p2465_p6 = scmp.ne.s32.totalorder %s3194_s4, %s2464_s16  ;;  %p2471_p5 = scmp.lt.u32.totalorder %s2464_s16, %s3194_s4 }
  0x59   : > { %p2467_p10 = pnand %p2465_p6, %p2779_p13 }
  0x5b   : > { %p2468_p3 = pneg %p2467_p10 }
  0x5d   : > { %p2473_p7 = pnand %p2471_p5, %p2468_p3 }
  0x5f   : > { %2476 = shalt.err (!%p2473_p7)
}
  0x60   : > { %s2477_s7 = scalar_lea.vmem %s233_s12, 2048  ;;  %p2485_p1 = scmp.lt.s32.totalorder %s233_s12, %s233_s12 }
  0x61   : > { %p2478_p9 = scmp.ne.s32.totalorder %s233_s12, %s2477_s7  ;;  %p2486_p2 = scmp.lt.s32.totalorder %s2477_s7, %s2477_s7 }
  0x63   : > { %p2480_p12 = pnand %p2478_p9, %p2779_p13  ;;  %p2487_p4 = por %p2486_p2, %p2485_p1 }
  0x65   : > { %p2481_p0 = pneg %p2480_p12 }
  0x67   : > { %p2488_p8 = pnand %p2487_p4, %p2481_p0 }
  0x69   : > { %2491 = shalt.err (!%p2488_p8)
}
  0x6a   : > { %2325 = dma.hbm_to_vmem [thread:$0]  (!%p2763_p11), %s3194_s4, 2048, %s233_s12, [#allocation9], %s3180_s30, %s3180_s30, %s3181_s9  }
  0x6b   : > { %s2669_s13 = smov [#allocation11]   ;;  %s2492_s17 = scalar_lea.hbm %s3175_s5, 2048 }
  0x6c   : > { %s245_s14 = sshll.u32 %s2669_s13, 4  ;;  %p2493_p4 = scmp.ne.s32.totalorder %s3175_s5, %s2492_s17  ;;  %s246_s14 = int_to_ptr.vmem [resolvable:$true] %s245_s14 }
  0x6d   : > { %p2499_p10 = scmp.lt.u32.totalorder %s2492_s17, %s3175_s5 }
  0x6e   : > { %p2495_p8 = pnand %p2493_p4, %p2779_p13 }
  0x70   : > { %p2496_p6 = pneg %p2495_p8 }
  0x72   : > { %p2501_p3 = pnand %p2499_p10, %p2496_p6 }
  0x74   : > { %2504 = shalt.err (!%p2501_p3)
}
  0x75   : > { %s2505_s12 = scalar_lea.vmem %s246_s14, 2048  ;;  %p2513_p12 = scmp.lt.s32.totalorder %s246_s14, %s246_s14 }
  0x76   : > { %p2506_p5 = scmp.ne.s32.totalorder %s246_s14, %s2505_s12  ;;  %p2514_p0 = scmp.lt.s32.totalorder %s2505_s12, %s2505_s12 }
  0x78   : > { %p2508_p7 = pnand %p2506_p5, %p2779_p13  ;;  %p2515_p1 = por %p2514_p0, %p2513_p12 }
  0x7a   : > { %p2509_p9 = pneg %p2508_p7 }
  0x7c   : > { %p2516_p2 = pnand %p2515_p1, %p2509_p9 }
  0x7e   : > { %2519 = shalt.err (!%p2516_p2)
}
  0x7f   : > { %2328 = dma.hbm_to_vmem [thread:$0]  (!%p2763_p11), %s3175_s5, 2048, %s246_s14, [#allocation12], %s3180_s30, %s3180_s30, %s3181_s9  }
  0x80   : > { %s2873_s18 = sadd.s32 1, %s2662_s24   ;;  %s34_s8 = sadd.s32 1, %s2658_s23 }
  0x81   : > { %s31_s13 = ssub.s32 %s2662_s24, %s2873_s18  ;;  %p41_p13 = scmp.ne.s32.totalorder %s2658_s23, %s2654_s22 }
  0x82   : > { %p32_p4 = scmp.eq.s32.totalorder %s31_s13, 0  ;;  %p42_p8 = scmp.eq.s32.totalorder %s2662_s24, 0 }
  0x83   : > { %p3195_p6 = scmp.eq.s32.totalorder %s2733_s25, 1  ;;  %p2344_p3 = scmp.lt.s32.totalorder %s2662_s24, 2 }
  0x84   : > { %s2889_s16 = scalar_select %p32_p4, %s2658_s23, %s34_s8  }
  0x85   : > { %p2883_p10 = por %p3195_p6, %p41_p13  ;;  %p43_p5 = por %p42_p8, %p41_p13 }
  0x86   : > { %s2892_s17 = sand.u32 1, %s2658_s23   ;;  %s2005_s19 = sshll.u32 %s2662_s24, 8 }
  0x87   : > { %s3196_s15 = scalar_select %p2883_p10, 1, 0 }
  0x88   : > { %s1960_s14 = sshll.u32 %s2892_s17, 4  ;;  %s3197_s0 = sld [smem:[#allocation20_spill]] }
  0x89   : > { %s263_s12 = scalar_lea.vmem [#allocation2], %s1960_s14  ;;  %p2903_p11 = pnand %p2344_p3, %p43_p5 }
  0x8a   : > { %s270_s10 = sshll.u32 %s263_s12, 4  ;;  %s1963_s13 = sshll.u32 %s2892_s17, 3  ;;  %s2901_s10 = int_to_ptr.vmem [resolvable:$true] %s270_s10 }
  0x8b   : > { %s260_s30 = scalar_lea.sflag [#allocation3], %s2892_s17  ;;  %p2522_p9 = pneg %p2903_p11 }
  0x8e   : > { %s2899_s7 = scalar_lea.hbm %s3197_s0, %s2005_s19  ;;  %s2525_s26 = scalar_lea.hbm %s3197_s0, 512 }
  0x8f   : > { %s2520_s20 = scalar_lea.hbm %s2899_s7, 256  ;;  %p2526_p1 = scmp.lt.u32.totalorder %s2899_s7, %s3197_s0 }
  0x90   : > { %p2521_p7 = scmp.ne.s32.totalorder %s2899_s7, %s2520_s20  ;;  %p2527_p2 = scmp.lt.u32.totalorder %s2525_s26, %s2520_s20 }
  0x91   : > { %p2529_p4 = scmp.lt.u32.totalorder %s2520_s20, %s2899_s7 }
  0x92   : > { %p2523_p12 = pnand %p2522_p9, %p2521_p7  ;;  %p2528_p13 = por %p2527_p2, %p2526_p1 }
  0x94   : > { %p2524_p0 = pneg %p2523_p12  ;;  %p2530_p8 = por %p2529_p4, %p2528_p13 }
  0x96   : > { %p2531_p6 = pnand %p2530_p8, %p2524_p0 }
  0x98   : > { %2534 = shalt.err (!%p2531_p6)
}
  0x99   : > { %s2535_s8 = scalar_lea.vmem %s2901_s10, 256  ;;  %s2670_s14 = smov [#allocation2]  }
  0x9a   : > { %p2536_p3 = scmp.ne.s32.totalorder %s2901_s10, %s2535_s8  ;;  %s2540_s19 = sshll.u32 %s2670_s14, 4  ;;  %s2541_s19 = int_to_ptr.vmem [resolvable:$false] %s2540_s19 }
  0x9b   : > { %s2542_s9 = scalar_lea.vmem %s2541_s19, 512  ;;  %p2543_p12 = scmp.lt.s32.totalorder %s2901_s10, %s2541_s19 }
  0x9c   : > { %p2538_p5 = pnand %p2536_p3, %p2522_p9  ;;  %p2544_p1 = scmp.lt.s32.totalorder %s2542_s9, %s2535_s8 }
  0x9e   : > { %p2539_p7 = pneg %p2538_p5  ;;  %p2545_p2 = por %p2544_p1, %p2543_p12 }
  0xa0   : > { %p2546_p13 = pnand %p2545_p2, %p2539_p7 }
  0xa2   : > { %2549 = shalt.err (!%p2546_p13)
}
  0xa3   : > { %s3199_s20 = smov 8   ;;  %s3200_s26 = smov 128  }
  0xa4   : > { %2332 = dma.hbm_to_vmem [thread:$0]  (!%p2903_p11), %s2899_s7, 256, %s2901_s10, %s260_s30, %s3200_s26, %s3200_s26, %s3199_s20  }
  0xa5   : > { %s1964_s12 = sshll.u32 %s2662_s24, 7  ;;  %s284_s9 = scalar_lea.vmem [#allocation5], %s1963_s13 }
  0xa6   : > { %s2944_s19 = scalar_lea.hbm %s3171_s1, %s1964_s12  ;;  %s291_s0 = sshll.u32 %s284_s9, 4  ;;  %s292_s0 = int_to_ptr.vmem [resolvable:$true] %s291_s0 }
  0xa7   : > { %s3201_s2 = sand.u32 1, %s2662_s24   ;;  %s2550_s4 = scalar_lea.hbm %s2944_s19, 128 }
  0xa8   : > { %s281_s3 = scalar_lea.sflag [#allocation6], %s3201_s2  ;;  %p2551_p0 = scmp.ne.s32.totalorder %s2944_s19, %s2550_s4 }
  0xa9   : > { %s2555_s10 = scalar_lea.hbm %s3171_s1, 256  ;;  %p2556_p6 = scmp.lt.u32.totalorder %s2944_s19, %s3171_s1 }
  0xaa   : > { %p2553_p4 = pnand %p2551_p0, %p2522_p9  ;;  %p2557_p3 = scmp.lt.u32.totalorder %s2555_s10, %s2550_s4 }
  0xab   : > { %p2559_p7 = scmp.lt.u32.totalorder %s2550_s4, %s2944_s19 }
  0xac   : > { %p2554_p8 = pneg %p2553_p4  ;;  %p2558_p5 = por %p2557_p3, %p2556_p6 }
  0xae   : > { %p2560_p12 = por %p2559_p7, %p2558_p5 }
  0xb0   : > { %p2561_p1 = pnand %p2560_p12, %p2554_p8 }
  0xb2   : > { %2564 = shalt.err (!%p2561_p1)
}
  0xb3   : > { %s2565_s2 = scalar_lea.vmem %s292_s0, 128  ;;  %s2671_s13 = smov [#allocation5]  }
  0xb4   : > { %p2566_p2 = scmp.ne.s32.totalorder %s292_s0, %s2565_s2  ;;  %s2570_s26 = sshll.u32 %s2671_s13, 4  ;;  %s2571_s26 = int_to_ptr.vmem [resolvable:$false] %s2570_s26 }
  0xb5   : > { %s2572_s12 = scalar_lea.vmem %s2571_s26, 256  ;;  %p2573_p4 = scmp.lt.s32.totalorder %s292_s0, %s2571_s26 }
  0xb6   : > { %p2568_p13 = pnand %p2566_p2, %p2522_p9  ;;  %p2574_p10 = scmp.lt.s32.totalorder %s2572_s12, %s2565_s2 }
  0xb8   : > { %p2569_p0 = pneg %p2568_p13  ;;  %p2575_p3 = por %p2574_p10, %p2573_p4 }
  0xba   : > { %p2576_p6 = pnand %p2575_p3, %p2569_p0 }
  0xbc   : > { %2579 = shalt.err (!%p2576_p6)
}
  0xbd   : > { %2335 = dma.hbm_to_vmem [thread:$0]  (!%p2903_p11), %s2944_s19, 128, %s292_s0, %s281_s3  }
  0xbe   : > { %p3202_p8 = scmp.ne.s32.totalorder %s3189_s29, 0 }
  0xbf   : > { %s2972_s4 = sand.u32 (!%p3202_p8), 1, %s2654_s22   ;;  %p3203_p10 = scmp.ne.s32.totalorder (!%p3202_p8), %s3187_s27, 0 }
  0xc0   : > { %300 = sbr.rel (%p3202_p8) target bundleno = 3007 (0xbbf), region = 44  ;;  %s1966_s14 = sshll.u32 (!%p3202_p8), %s2972_s4, 4 }
  0xc1   : > { %s303_s8 = scalar_lea.sflag (!%p3202_p8), [#allocation3], %s2972_s4  ;;  %s2976_s9 = scalar_lea.vmem (!%p3202_p8), [#allocation2], %s1966_s14 }
  0xc7   : > { %2625 = dma.done.wait (%p3203_p10), %s303_s8, 256  }
  0xc8   : > { %2627 = vsyncadd (%p3203_p10), %s303_s8, 4294967040  ;;  %s311_s0 = sand.u32 1, %s2733_s25   ;;  %s1967_s3 = sshll.u32 %s2972_s4, 3 }
  0xc9   : > { %s312_s29 = scalar_lea.sflag [#allocation6], %s311_s0  ;;  %s2986_s11 = scalar_lea.vmem [#allocation5], %s1967_s3 }
  0xca   : > { %2629 = dma.done.wait (%p3203_p10), %s312_s29, 128  }
  0xcb   : > { %2631 = vsyncadd (%p3203_p10), %s312_s29, 4294967168  ;;  %p3204_p11 = scmp.eq.s32.totalorder %s2733_s25, 0 }
  0xcd   : > { %2633 = dma.done.wait (%p3204_p11), [#allocation6], 512   ;;  %p3205_p9 = pmov %p3204_p11 }
  0xcf   : > { %2635 = vsyncadd (%p3205_p9), [#allocation6], 4294966784  ;;  %p3206_p5 = pmov %p3205_p9 }
  0xd1   : > { %2637 = dma.done.wait (%p3206_p5), [#allocation9], 2560   ;;  %p3207_p7 = pmov %p3206_p5 }
  0xd2   : > { %p3208_p12 = pmov %p3206_p5 }
  0xd3   : > { %2639 = vsyncadd (%p3207_p7), [#allocation9], 4294964736 }
  0xd4   : > { %2641 = dma.done.wait (%p3208_p12), [#allocation12], 2048   ;;  %p3209_p1 = pmov %p3206_p5 }
  0xd5   : > { %v2672_v0 = vmov 0.0|0.0   ;;  %vm2673_vm0 = vmmov 0   ;;  %v2674_v1 = vmov 0.0   ;;  %vm372_vm1 = vcmask 261120   ;;  %v368_v2 = vld [vmem:[#allocation7] sm:$0xff]  ;;  %v369_v3 = vld [vmem:[#allocation7 + $0x8] sm:$0xff] }
  0xd6   : > { %2643 = vsyncadd (%p3209_p1), [#allocation12], 4294965248  ;;  %2246 = vmatprep.subr.bf16.mxu0 %v2672_v0  ;;  %2125 = vmatprep.mubr.msk.f32.mxu0 %vm2673_vm0, %v2674_v1  ;;  %v370_v4 = vld [vmem:[#allocation7 + $0x10] sm:$0xff]  ;;  %v2224_v5 = vpack.c.bf16 %v369_v3, %v368_v2  ;;  %v371_v6 = vld [vmem:[#allocation7 + $0x18] sm:$0xff]  ;;  %vm708_vm2 = vcmask 1043456   ;;  %vm693_vm3 = vcmask 31744  }
  0xd7   : > { %v365_v7 = vld [vmem:[%s2976_s9] sm:$0xff]  ;;  %v2228_v8 = vpack.c.bf16 %v371_v6, %v370_v4  ;;  %v455_v10 = vld [vmem:[#allocation8 + $0x8] sm:$0xff]  ;;  %v457_v13 = vld [vmem:[#allocation8 + $0x18] sm:$0xff]  ;;  %s2675_s27 = smov 32   ;;  %s2002_s19 = sshll.u32 %s2733_s25, 7  ;;  %vm1806_vm4 = vcmask 523264  }
  0xd8   : > { %2082 = vmatprep.mubr.msk.f32.mxu1 %vm372_vm1, %v365_v7  ;;  %v454_v9 = vld [vmem:[#allocation8] sm:$0xff]  ;;  %2225 = vmatprep.subr.bf16.mxu1 %v2224_v5  ;;  %v456_v12 = vld [vmem:[#allocation8 + $0x10] sm:$0xff]  ;;  %v366_v14 = vld [vmem:[%s2976_s9 + $0x8] sm:$0xff]  ;;  %s364_s30 = scalar_lea.vmem [#allocation13], %s1967_s3  ;;  %s3125_s20 = scalar_lea.hbm %s3176_s6, %s2002_s19 }
  0xd9   : > { %2227 = vmatpush3.bf16.msra.mxu1 %v2224_v5  ;;  %v2232_v11 = vpack.c.bf16 %v455_v10, %v454_v9  ;;  %v2236_v15 = vpack.c.bf16 %v457_v13, %v456_v12  ;;  %v541_v16 = vld [vmem:[#allocation10] sm:$0xff]  ;;  %v542_v17 = vld [vmem:[#allocation10 + $0x8] sm:$0xff]  ;;  %v543_v19 = vld [vmem:[#allocation10 + $0x10] sm:$0xff]  ;;  %s1822_s7 = sshll.u32 %s364_s30, 4  ;;  %s1809_s25 = scalar_lea.sflag [#allocation4], %s2972_s4  ;;  %s3127_s7 = int_to_ptr.vmem [resolvable:$true] %s1822_s7 }
  0xda   : > { %2229 = vmatprep.subr.bf16.mxu1 %v2228_v8  ;;  %v2241_v18 = vpack.c.bf16 %v542_v17, %v541_v16  ;;  %v544_v20 = vld [vmem:[#allocation10 + $0x18] sm:$0xff]  ;;  %v782_v29 = vld [vmem:[#allocation10 + $0x20] sm:$0xff]  ;;  %v783_v30 = vld [vmem:[#allocation10 + $0x28] sm:$0xff]  ;;  %s2580_s2 = scalar_lea.vmem %s3127_s7, 128  ;;  %p3210_p13 = scmp.ne.s32.totalorder %s3196_s15, 0 }
  0xdb   : > { %v2244_v21 = vpack.c.bf16 %v544_v20, %v543_v19  ;;  %v3018_v22 = vld [vmem:[%s2986_s11] sm:$0xff]  ;;  %v2247_v32 = vpack.c.bf16 %v783_v30, %v782_v29  ;;  %v1018_v50 = vld [vmem:[#allocation10 + $0x40] sm:$0xff]  ;;  %v1019_v51 = vld [vmem:[#allocation10 + $0x48] sm:$0xff]  ;;  %p2581_p2 = scmp.ne.s32.totalorder %s3127_s7, %s2580_s2  ;;  %s2676_s13 = smov [#allocation13]  }
  0xdc   : > { %v784_v31 = vld [vmem:[#allocation10 + $0x30] sm:$0xff]  ;;  %v785_v33 = vld [vmem:[#allocation10 + $0x38] sm:$0xff]  ;;  %v2253_v53 = vpack.c.bf16 %v1019_v51, %v1018_v50  ;;  %v1254_v6 = vld [vmem:[#allocation10 + $0x60] sm:$0xff]  ;;  %s2584_s26 = sshll.u32 %s2676_s13, 4  ;;  %s2585_s26 = int_to_ptr.vmem [resolvable:$false] %s2584_s26 }
  0xdd   : > { %2231 = vmatpush3.bf16.msra.mxu1 %v2228_v8  ;;  %2248 = vmatpush3.bf16.msra.mxu0 %v2247_v32  ;;  %v2250_v34 = vpack.c.bf16 %v785_v33, %v784_v31  ;;  %v1020_v52 = vld [vmem:[#allocation10 + $0x50] sm:$0xff]  ;;  %v1021_v54 = vld [vmem:[#allocation10 + $0x58] sm:$0xff]  ;;  %v1494_v12 = vld [vmem:[#allocation11 + $0x20] sm:$0xff]  ;;  %p2582_p0 = pnand %p2581_p2, %p3210_p13  ;;  %s2586_s12 = scalar_lea.vmem %s2585_s26, 256 }
  0xde   : > { %2233 = vmatprep.subr.bf16.mxu1 %v2232_v11  ;;  %2249 = vmatprep.subr.bf16.mxu0 %v2672_v0  ;;  %v2256_v55 = vpack.c.bf16 %v1021_v54, %v1020_v52  ;;  %v1256_v8 = vld [vmem:[#allocation10 + $0x70] sm:$0xff]  ;;  %v1257_v10 = vld [vmem:[#allocation10 + $0x78] sm:$0xff]  ;;  %v1495_v13 = vld [vmem:[#allocation11 + $0x28] sm:$0xff]  ;;  %p2587_p3 = scmp.lt.s32.totalorder %s3127_s7, %s2585_s26  ;;  %p2588_p6 = scmp.lt.s32.totalorder %s2586_s12, %s2580_s2 }
  0xdf   : > { %v1497_v16 = vld [vmem:[#allocation11 + $0x38] sm:$0xff]  ;;  %p2583_p4 = pneg %p2582_p0 }
  0xe0   : > { %2083 = vmatmul.mubr.msk.f32.vlgmr.msra.gmra.mrb[0].mxu1 %vm372_vm1, %v366_v14  ;;  %p2589_p8 = por %p2588_p6, %p2587_p3 }
  0xe1   : > { %2235 = vmatpush3.bf16.msra.mxu1 %v2232_v11  ;;  %2093 = vmatprep.mubr.msk.f32.mxu1 %vm372_vm1, %v365_v7  ;;  %v1255_v7 = vld [vmem:[#allocation10 + $0x68] sm:$0xff]  ;;  %v2262_v11 = vpack.c.bf16 %v1257_v10, %v1256_v8 }
  0xe2   : > { %2237 = vmatprep.subr.bf16.mxu1 %v2236_v15  ;;  %2251 = vmatpush3.bf16.msra.mxu0 %v2250_v34  ;;  %v2259_v9 = vpack.c.bf16 %v1255_v7, %v1254_v6  ;;  %p2590_p10 = pnand %p2589_p8, %p2583_p4 }
  0xe3   : > { %2252 = vmatprep.subr.bf16.mxu0 %v2672_v0 }
  0xe5   : > { %2239 = vmatpush3.bf16.msra.mxu1 %v2236_v15  ;;  %2126 = vmatmul.mubr.msk.f32.vlgmr.msra.gmra.mrb[0].mxu0 %vm372_vm1, %v3018_v22  ;;  %v1496_v15 = vld [vmem:[#allocation11 + $0x30] sm:$0xff] }
  0xe6   : > { %2240 = vmatprep.subr.bf16.mxu1 %v2672_v0  ;;  %2146 = vmatprep.mubr.msk.f32.mxu0 %vm2673_vm0, %v2674_v1  ;;  %v2268_v17 = vpack.c.bf16 %v1497_v16, %v1496_v15 }
  0xe7   : > { %2254 = vmatpush3.bf16.msra.mxu0 %v2253_v53 }
  0xe8   : > { %2094 = vmatmul.mubr.msk.f32.vlgmr.msra.gmra.mrb[2].mxu1 %vm372_vm1, %v366_v14  ;;  %2255 = vmatprep.subr.bf16.mxu0 %v2672_v0  ;;  %v2265_v14 = vpack.c.bf16 %v1495_v13, %v1494_v12 }
  0xe9   : > { %2242 = vmatpush3.bf16.msra.mxu1 %v2241_v18  ;;  %2104 = vmatprep.mubr.msk.f32.mxu1 %vm2673_vm0, %v2674_v1 }
  0xea   : > { %2243 = vmatprep.subr.bf16.mxu1 %v2672_v0 }
  0xeb   : > { %2257 = vmatpush3.bf16.msra.mxu0 %v2256_v55 }
  0xec   : > { %2258 = vmatprep.subr.bf16.mxu0 %v2672_v0 }
  0xed   : > { %2245 = vmatpush3.bf16.msra.mxu1 %v2244_v21  ;;  %v1489_v21 = vld [vmem:[#allocation11] sm:$0xff] }
  0xee   : > { %2107 = vmatprep.subr.mxu1 %v2674_v1  ;;  %2147 = vmatmul.mubr.msk.f32.vlgmr.msra.gmra.mrb[2].mxu0 %vm372_vm1, %v3018_v22 }
  0xef   : > { %2167 = vmatprep.mubr.msk.f32.mxu0 %vm2673_vm0, %v2674_v1  ;;  %2260 = vmatpush3.bf16.msra.mxu0 %v2259_v9 }
  0xf0   : > { %2105 = vmatmul.mubr.msk.f32.vlgmr.msra.gmra.mrb[4].mxu1 %vm372_vm1, %v3018_v22  ;;  %2261 = vmatprep.subr.bf16.mxu0 %v2672_v0 }
  0xf1   : > { %2109 = vmatprep.mubr.msk.f32.mxu1 %vm2673_vm0, %v2674_v1 }
  0xf3   : > { %2263 = vmatpush3.bf16.msra.mxu0 %v2262_v11 }
  0xf4   : > { %2264 = vmatprep.subr.bf16.mxu0 %v2672_v0 }
  0xf6   : > { %2168 = vmatmul.mubr.msk.f32.vlgmr.msra.gmra.mrb[4].mxu0 %vm372_vm1, %v3018_v22 }
  0xf7   : > { %2266 = vmatpush3.bf16.msra.mxu0 %v2265_v14  ;;  %2188 = vmatprep.mubr.msk.f32.mxu0 %vm2673_vm0, %v2674_v1 }
  0xf8   : > { %2267 = vmatprep.subr.bf16.mxu0 %v2672_v0 }
  0xfb   : > { %2269 = vmatpush3.bf16.msra.mxu0 %v2268_v17 }
  0xfc   : > { %2270 = vmatprep.subr.bf16.mxu0 %v2672_v0 }
 0x1b3   : > { %v3025_v23 = vpop.f32.mrb[0].mxu1 }
 0x1b4   : > { %v445_v24 = vpop.f32.mrb[1].mxu1  ;;  %v536_v51 = vcombine.high %v3025_v23, %v3025_v23 }
 0x1b5   : > { %2108 = vmatpush3.xpose.msk.msra.mxu1 %vm372_vm1, %v445_v24  ;;  %v535_v48 = vcombine.high %v445_v24, %v445_v24  ;;  %v1490_v24 = vld [vmem:[#allocation11 + $0x8] sm:$0xff] }
 0x1b6   : > { %2112 = vmatprep.subr.mxu1 %v2674_v1 }
 0x1b8   : > { %v852_v43 = vpop.f32.mrb[0].mxu0 }
 0x1b9   : > { %v2127_v44 = vpop.f32.mrb[1].mxu0 }
 0x1ba   : > { %v1647_v44 = vld [vmem:[#allocation11 + $0x50] sm:$0xff] }
 0x1bb   : > { %v3029_v25 = vpop.f32.mrb[2].mxu1 }
 0x1bc   : > { %v524_v26 = vpop.f32.mrb[3].mxu1  ;;  %v540_v52 = vcombine.high %v3029_v25, %v3029_v25 }
 0x1bd   : > { %v539_v49 = vcombine.high %v524_v26, %v524_v26 }
 0x1c1   : > { %v1088_v4 = vpop.f32.mrb[2].mxu0 }
 0x1c2   : > { %v2148_v5 = vpop.f32.mrb[3].mxu0 }
 0x1c3   : > { %v614_v27 = vpop.f32.mrb[4].mxu1 }
 0x1c4   : > { %v2106_v28 = vpop.f32.mrb[5].mxu1  ;;  %2110 = vmatmul.mubr.msk.f32.vlgmr.msra.gmra.mrb[6].mxu1 %vm372_vm1, %v614_v27  ;;  %v1491_v27 = vld [vmem:[#allocation11 + $0x10] sm:$0xff] }
 0x1c5   : > { %2113 = vmatpush3.msk.msra.mxu1 %vm708_vm2, %v524_v26  ;;  %2114 = vmatprep.mubr.msk.f32.mxu1 %vm2673_vm0, %v2674_v1  ;;  %v2271_v26 = vpack.c.bf16 %v1490_v24, %v1489_v21  ;;  %v1492_v28 = vld [vmem:[#allocation11 + $0x18] sm:$0xff] }
 0x1c6   : > { %2128 = vmatprep.subr.mxu1 %v2674_v1  ;;  %v2274_v31 = vpack.c.bf16 %v1492_v28, %v1491_v27 }
 0x297   : > { %v689_v35 = vpop.f32.mrb[6].mxu1 }
 0x298   : > { %v2111_v36 = vpop.f32.mrb[7].mxu1  ;;  %v694_v37 = vsel %vm693_vm3, %v689_v35, -inf }
 0x299   : > { %695 = vmax.xlane.f32.xlu0 %v694_v37 }
 0x326   : > { %v696_v38 = vpop.xlane.xlu0 %695 }
 0x327   : > { %v697_v39 = vsub.f32 %v689_v35, %v696_v38 }
 0x329   : > { %v698_v40 = vmul.f32 1.442695, %v697_v39 }
 0x32b   : > { %2392 = vpow2.f32 %v698_v40  ;;  %v1324_v40 = vpop.f32.mrb[4].mxu0 }
 0x335   : > { %v2393_v41 = vpop.eup %2392 }
 0x336   : > { %v700_v42 = vsel %vm693_vm3, %v2393_v41, 0.0 }
 0x337   : > { %701 = vadd.xlane.f32.xlu0 %v700_v42  ;;  %v1645_v42 = vld [vmem:[#allocation11 + $0x40] sm:$0xff] }
 0x3c4   : > { %v702_v45 = vpop.xlane.xlu0 %701 }
 0x3c5   : > { %2394 = vrcp.f32 %v702_v45 }
 0x3cf   : > { %v2395_v46 = vpop.eup %2394 }
 0x3d0   : > { %v704_v47 = vmul.f32 %v2395_v46, %v2393_v41  ;;  %v2169_v41 = vpop.f32.mrb[5].mxu0  ;;  %v1648_v46 = vld [vmem:[#allocation11 + $0x58] sm:$0xff] }
 0x3d2   : > { %2115 = vmatmul.mubr.msk.f32.vlgmr.msra.gmra.mrb[8].mxu1 %vm693_vm3, %v704_v47  ;;  %v2280_v47 = vpack.c.bf16 %v1648_v46, %v1647_v44 }
 0x3d3   : > { %2129 = vmatpush3.xpose.msk.msra.mxu1 %vm372_vm1, %v535_v48  ;;  %2130 = vmatprep.mubr.msk.f32.mxu1 %vm2673_vm0, %v2674_v1 }
 0x3d4   : > { %2133 = vmatprep.subr.mxu1 %v2674_v1 }
 0x3d6   : > { %2131 = vmatmul.mubr.msk.f32.vlgmr.msra.gmra.mrb[10].mxu1 %vm372_vm1, %v852_v43  ;;  %v1646_v43 = vld [vmem:[#allocation11 + $0x48] sm:$0xff] }
 0x3d7   : > { %2134 = vmatpush3.msk.msra.mxu1 %vm708_vm2, %v539_v49  ;;  %2135 = vmatprep.mubr.msk.f32.mxu1 %vm2673_vm0, %v2674_v1  ;;  %v2277_v45 = vpack.c.bf16 %v1646_v43, %v1645_v42 }
 0x3d8   : > { %2149 = vmatprep.subr.mxu1 %v2674_v1 }
 0x4a5   : > { %v3060_v56 = vpop.f32.mrb[8].mxu1 }
 0x4a6   : > { %v2116_v57 = vpop.f32.mrb[9].mxu1 }
 0x4a9   : > { %v927_v58 = vpop.f32.mrb[10].mxu1 }
 0x4aa   : > { %v2132_v59 = vpop.f32.mrb[11].mxu1  ;;  %v931_v60 = vsel %vm693_vm3, %v927_v58, -inf }
 0x4ab   : > { %932 = vmax.xlane.f32.xlu1 %v931_v60 }
 0x538   : > { %v933_v61 = vpop.xlane.xlu1 %932 }
 0x539   : > { %v934_v62 = vsub.f32 %v927_v58, %v933_v61  ;;  %v1724_v61 = vld [vmem:[#allocation11 + $0x60] sm:$0xff] }
 0x53b   : > { %v935_v63 = vmul.f32 1.442695, %v934_v62  ;;  %v1725_v62 = vld [vmem:[#allocation11 + $0x68] sm:$0xff] }
 0x53d   : > { %2396 = vpow2.f32 %v935_v63  ;;  %v1726_v63 = vld [vmem:[#allocation11 + $0x70] sm:$0xff] }
 0x547   : > { %v2397_v2 = vpop.eup %2396 }
 0x548   : > { %v937_v3 = vsel %vm693_vm3, %v2397_v2, 0.0 }
 0x549   : > { %938 = vadd.xlane.f32.xlu1 %v937_v3  ;;  %v1727_v3 = vld [vmem:[#allocation11 + $0x78] sm:$0xff] }
 0x5d6   : > { %v939_v18 = vpop.xlane.xlu1 %938 }
 0x5d7   : > { %2398 = vrcp.f32 %v939_v18 }
 0x5e1   : > { %v2399_v19 = vpop.eup %2398 }
 0x5e2   : > { %v941_v20 = vmul.f32 %v2399_v19, %v2397_v2  ;;  %v2283_v2 = vpack.c.bf16 %v1725_v62, %v1724_v61 }
 0x5e4   : > { %2136 = vmatmul.mubr.msk.f32.vlgmr.msra.gmra.mrb[12].mxu1 %vm693_vm3, %v941_v20 }
 0x5e5   : > { %2150 = vmatpush3.xpose.msk.msra.mxu1 %vm372_vm1, %v3025_v23  ;;  %2151 = vmatprep.mubr.msk.f32.mxu1 %vm2673_vm0, %v2674_v1 }
 0x5e6   : > { %2154 = vmatprep.subr.mxu1 %v2674_v1 }
 0x5e8   : > { %2152 = vmatmul.mubr.msk.f32.vlgmr.msra.gmra.mrb[14].mxu1 %vm372_vm1, %v1088_v4 }
 0x5e9   : > { %2155 = vmatpush3.msk.msra.mxu1 %vm708_vm2, %v3029_v25  ;;  %2156 = vmatprep.mubr.msk.f32.mxu1 %vm2673_vm0, %v2674_v1 }
 0x5ea   : > { %2170 = vmatprep.subr.mxu1 %v2674_v1 }
 0x6b7   : > { %v1013_v29 = vpop.f32.mrb[12].mxu1 }
 0x6b8   : > { %v2137_v30 = vpop.f32.mrb[13].mxu1  ;;  %2189 = vmatmul.mubr.msk.f32.vlgmr.msra.gmra.mrb[6].mxu0 %vm372_vm1, %v1013_v29 }
 0x6b9   : > { %2272 = vmatpush3.bf16.msra.mxu0 %v2271_v26  ;;  %2199 = vmatprep.mubr.msk.f32.mxu0 %vm2673_vm0, %v2674_v1 }
 0x6ba   : > { %2273 = vmatprep.subr.bf16.mxu0 %v2672_v0 }
 0x6bb   : > { %v1163_v32 = vpop.f32.mrb[14].mxu1 }
 0x6bc   : > { %v2153_v33 = vpop.f32.mrb[15].mxu1  ;;  %v1167_v34 = vsel %vm693_vm3, %v1163_v32, -inf }
 0x6bd   : > { %2275 = vmatpush3.bf16.msra.mxu0 %v2274_v31  ;;  %1168 = vmax.xlane.f32.xlu0 %v1167_v34 }
 0x6be   : > { %2276 = vmatprep.subr.bf16.mxu0 %v2672_v0 }
 0x6c0   : > { %2200 = vmatmul.mubr.msk.f32.vlgmr.msra.gmra.mrb[6].mxu0 %vm372_vm1, %v3060_v56 }
 0x6c1   : > { %2210 = vmatprep.mubr.msk.f32.mxu0 %vm2673_vm0, %v2674_v1  ;;  %2278 = vmatpush3.bf16.msra.mxu0 %v2277_v45 }
 0x6c2   : > { %2279 = vmatprep.subr.bf16.mxu0 %v2672_v0 }
 0x6c5   : > { %2281 = vmatpush3.bf16.msra.mxu0 %v2280_v47 }
 0x6c6   : > { %2282 = vmatprep.subr.bf16.mxu0 %v2672_v0 }
 0x74a   : > { %v1169_v35 = vpop.xlane.xlu0 %1168 }
 0x74b   : > { %v1170_v36 = vsub.f32 %v1163_v32, %v1169_v35 }
 0x74d   : > { %v1171_v37 = vmul.f32 1.442695, %v1170_v36 }
 0x74f   : > { %2400 = vpow2.f32 %v1171_v37 }
 0x759   : > { %v2401_v38 = vpop.eup %2400 }
 0x75a   : > { %v1173_v39 = vsel %vm693_vm3, %v2401_v38, 0.0 }
 0x75b   : > { %1174 = vadd.xlane.f32.xlu1 %v1173_v39 }
 0x7e8   : > { %v1175_v48 = vpop.xlane.xlu1 %1174 }
 0x7e9   : > { %2402 = vrcp.f32 %v1175_v48 }
 0x7f3   : > { %v2403_v49 = vpop.eup %2402 }
 0x7f4   : > { %v1177_v50 = vmul.f32 %v2403_v49, %v2401_v38 }
 0x7f6   : > { %2157 = vmatmul.mubr.msk.f32.vlgmr.msra.gmra.mrb[16].mxu1 %vm693_vm3, %v1177_v50 }
 0x7f7   : > { %2171 = vmatpush3.xpose.msk.msra.mxu1 %vm372_vm1, %v536_v51  ;;  %2172 = vmatprep.mubr.msk.f32.mxu1 %vm2673_vm0, %v2674_v1 }
 0x7f8   : > { %2175 = vmatprep.subr.mxu1 %v2674_v1 }
 0x7fa   : > { %2173 = vmatmul.mubr.msk.f32.vlgmr.msra.gmra.mrb[18].mxu1 %vm372_vm1, %v1324_v40 }
 0x7fb   : > { %2176 = vmatpush3.msk.msra.mxu1 %vm708_vm2, %v540_v52  ;;  %2177 = vmatprep.mubr.msk.f32.mxu1 %vm2673_vm0, %v2674_v1 }
 0x8c9   : > { %v1249_v23 = vpop.f32.mrb[16].mxu1 }
 0x8ca   : > { %v2158_v53 = vpop.f32.mrb[17].mxu1  ;;  %2211 = vmatmul.mubr.msk.f32.vlgmr.msra.gmra.mrb[6].mxu0 %vm372_vm1, %v1249_v23 }
 0x8cb   : > { %2221 = vmatprep.mubr.msk.f32.mxu0 %vm2673_vm0, %v2674_v1  ;;  %2284 = vmatpush3.bf16.msra.mxu0 %v2283_v2  ;;  %v2286_v1 = vpack.c.bf16 %v1727_v3, %v1726_v63 }
 0x8cc   : > { %2285 = vmatprep.subr.bf16.mxu0 %v2672_v0 }
 0x8cd   : > { %v1399_v54 = vpop.f32.mrb[18].mxu1 }
 0x8ce   : > { %v2174_v55 = vpop.f32.mrb[19].mxu1  ;;  %v1403_v56 = vsel %vm693_vm3, %v1399_v54, -inf }
 0x8cf   : > { %1404 = vmax.xlane.f32.xlu0 %v1403_v56  ;;  %2287 = vmatpush3.bf16.msra.mxu0 %v2286_v1 }
 0x8e5   : > { %1802 = vrot.lane.b32.xlu0 %v3018_v22, %s2675_s27 }
 0x95c   : > { %v1405_v25 = vpop.xlane.xlu0 %1404 }
 0x95d   : > { %v1406_v57 = vsub.f32 %v1399_v54, %v1405_v25 }
 0x95f   : > { %v1407_v58 = vmul.f32 1.442695, %v1406_v57 }
 0x960   : > { %v1803_v0 = vpop.permute.xlu0 %1802 }
 0x961   : > { %2404 = vpow2.f32 %v1407_v58 }
 0x96b   : > { %v2405_v59 = vpop.eup %2404 }
 0x96c   : > { %v1409_v60 = vsel %vm693_vm3, %v2405_v59, 0.0 }
 0x96d   : > { %1410 = vadd.xlane.f32.xlu1 %v1409_v60 }
 0x9fa   : > { %v1411_v4 = vpop.xlane.xlu1 %1410 }
 0x9fb   : > { %2406 = vrcp.f32 %v1411_v4 }
 0xa05   : > { %v2407_v5 = vpop.eup %2406 }
 0xa06   : > { %v1413_v6 = vmul.f32 %v2407_v5, %v2405_v59 }
 0xa08   : > { %2178 = vmatmul.mubr.msk.f32.vlgmr.msra.gmra.mrb[20].mxu1 %vm693_vm3, %v1413_v6 }
 0xadb   : > { %v1485_v7 = vpop.f32.mrb[20].mxu1 }
 0xadc   : > { %v2179_v8 = vpop.f32.mrb[21].mxu1  ;;  %2222 = vmatmul.mubr.msk.f32.vlgmr.msra.gmra.mrb[6].mxu0 %vm372_vm1, %v1485_v7 }
 0xbaf   : > { %v1797_v9 = vpop.f32.mrb[6].mxu0 }
 0xbb0   : > { %v1805_v22 = vsel %vm372_vm1, %v1797_v9, %v1803_v0  ;;  %v2223_v10 = vpop.f32.mrb[7].mxu0 }
 0xbb1   : > { %1807 = vst.msk [vmem:[%s364_s30] sm:$0xff] %vm1806_vm4, %v1805_v22 }
 0xbb2   : > { %2593 = shalt.err (!%p2590_p10)
}
 0xbb3   : > { %s2594_s4 = scalar_lea.hbm %s3125_s20, 128  ;;  %s2598_s9 = scalar_lea.hbm %s3176_s6, 256 }
 0xbb4   : > { %p2595_p11 = scmp.ne.s32.totalorder %s3125_s20, %s2594_s4  ;;  %p2599_p7 = scmp.lt.u32.totalorder %s3125_s20, %s3176_s6 }
 0xbb5   : > { %p2600_p12 = scmp.lt.u32.totalorder %s2598_s9, %s2594_s4  ;;  %p2602_p2 = scmp.lt.u32.totalorder %s2594_s4, %s3125_s20 }
 0xbb6   : > { %p2596_p9 = pnand %p2595_p11, %p3210_p13 }
 0xbb7   : > { %p2601_p1 = por %p2600_p12, %p2599_p7 }
 0xbb8   : > { %p2597_p5 = pneg %p2596_p9 }
 0xbb9   : > { %p2603_p0 = por %p2602_p2, %p2601_p1 }
 0xbbb   : > { %p2604_p4 = pnand %p2603_p0, %p2597_p5 }
 0xbbd   : > { %2607 = shalt.err (!%p2604_p4)
}
 0xbbe   : > { %2314 = dma.vmem_to_hbm [thread:$0]  (%p3210_p13), %s3127_s7, 128, %s3125_s20, %s1809_s25  }
 0xbbf PF: > { %s1834_s29 = sand.u32 1, %s2650_s21   ;;  %p3211_p3 = scmp.ne.s32.totalorder %s3188_s28, 0 }
 0xbc0   : > { %p3212_p6 = scmp.ge.s32.totalorder %s2662_s24, 2  ;;  %s1835_s11 = scalar_lea.sflag [#allocation4], %s1834_s29 }
 0xbc2   : > { %p2337_p8 = pnand %p3212_p6, %p3211_p3 }
 0xbc4   : > { %2645 = dma.done.wait (!%p2337_p8), %s1835_s11, 128  }
 0xbc5   : > { %2647 = vsyncadd (!%p2337_p8), %s1835_s11, 4294967168  ;;  %p24_p10 = scmp.ge.s32.totalorder %s2873_s18, 4   ;;  %s3213_s21 = smov %s2654_s22 }
 0xbc6   : > { %s3214_s22 = smov %s2658_s23  ;;  %s3215_s23 = smov %s2889_s16 }
 0xbc7   : > { %s3216_s24 = smov %s2873_s18  ;;  %26 = sbr.rel (!%p24_p10) target bundleno = 14 (0xe), region = 124 }
 0xbce   :  { %1840 = vsyncpa [#allocation3], 1 }
 0xbcf   :  { %1842 = vsyncpa [#allocation3 + $0x1], 1 }
 0xbd0   :  { %1843 = vsyncpa [#allocation6], 1 }
 0xbd1   :  { %1845 = vsyncpa [#allocation6 + $0x1], 1 }
 0xbd2   :  { %1846 = vsyncpa [#allocation9], 1 }
 0xbd3   :  { %1847 = vsyncpa [#allocation12], 1 }
 0xbd4   :  { %1848 = vsyncpa [#allocation4], 1 }
 0xbd5   :  { %1850 = vsyncpa [#allocation4 + $0x1], 1 }

</bundles_post_ra>
